<compile_context>
chip_gen: v6e
topology: v6e:2x2x1
jax: 0.10.0
libtpu: 0.0.40
codegen_flags: <defaults>
</compile_context>

<pallas_src>
import functools
import math

import jax
import jax.numpy as jnp
from jax import lax
from jax.experimental import pallas as pl
from jax.experimental.pallas import tpu as pltpu


def _rup(v, m):
    return ((v + m - 1) // m) * m


def _pad2(a, rows, cols):
    return jnp.pad(a, ((0, rows - a.shape[0]), (0, cols - a.shape[1])))


# --------------------------------------------------------------------------- #
# Kernel
# --------------------------------------------------------------------------- #
def _res_block_proj_kernel(
    x_ref,     # (bm, Cin_p)            bf16  stride-subsampled input pixels
    m_ref,     # (bm, 16)               f32   per-tap validity masks (cols 0..8)
    w1s_ref,   # (Cin_p, F1_p + F3_p)   bf16  [conv1 | shortcut] fused, BN folded
    w2_ref,    # (9*F1_p, F2_p)         bf16  conv2 3x3 im2col layout, BN2 folded
    w3_ref,    # (F2_p, F3_p)           bf16  conv3 1x1, BN3 folded
    b1s_ref,   # (1, F1_p + F3_p)       f32   [BN1 bias | shortcut BN bias]
    b2_ref,    # (1, F2_p)              f32
    b3_ref,    # (1, F3_p)              f32
    out_ref,   # (bm, F3_p)             bf16  lane-dense output tile
    *,
    Wo, F1_p,
):
    bm = x_ref.shape[0]
    F2_p = w2_ref.shape[1]

    x = x_ref[...]                                            # bf16
    m = m_ref[...]                                            # f32, loaded once

    # ---- fused conv1 + shortcut: ONE MXU pass over x -------------------------
    y = jnp.dot(x, w1s_ref[...], preferred_element_type=jnp.float32)
    y = y + b1s_ref[...]
    y1 = jnp.maximum(y[:, :F1_p], 0.0)                        # conv1+BN1+ReLU (f32)
    sc = y[:, F1_p:]                                          # shortcut+BN (no ReLU)

    # ---- conv2 (3x3, stride 1, pad 1): 9 accumulating matmuls ---------------
    # taps[p] = y1[p + off]; rows whose (h,w) neighbour is out of the image
    # (including cross-image / tile-wrap rows) are zeroed by the precomputed mask.
    acc = jnp.zeros((bm, F2_p), jnp.float32)
    tap = 0
    for dy in (-1, 0, 1):
        for dx in (-1, 0, 1):
            off = dy * Wo + dx
            if off == 0:
                src = y1
            else:
                src = pltpu.roll(y1, shift=(-off) % bm, axis=0)
                src = src * m[:, tap:tap + 1]
            acc = acc + jnp.dot(src.astype(jnp.bfloat16),
                                w2_ref[pl.ds(tap * F1_p, F1_p), :],
                                preferred_element_type=jnp.float32)
            tap += 1
    y2 = jnp.maximum(acc + b2_ref[...], 0.0).astype(jnp.bfloat16)

    # ---- conv3 (1x1) + BN3 bias, add shortcut, final ReLU --------------------
    y3 = jnp.dot(y2, w3_ref[...], preferred_element_type=jnp.float32)
    y3 = y3 + b3_ref[...]
    out_ref[...] = jnp.maximum(y3 + sc, 0.0).astype(out_ref.dtype)


# --------------------------------------------------------------------------- #
# Probe: does this JAX/Mosaic accept single-buffered constant specs?
# --------------------------------------------------------------------------- #
_BUFFERED1_OK = None


def _buffered1_supported():
    global _BUFFERED1_OK
    if _BUFFERED1_OK is not None:
        return _BUFFERED1_OK
    try:
        const = pl.BlockSpec((8, 128), lambda i: (0, 0),
                             pipeline_mode=pl.Buffered(1))

        def k(x_ref, c_ref, o_ref):
            o_ref[...] = x_ref[...] + c_ref[...]

        f = pl.pallas_call(
            k,
            out_shape=jax.ShapeDtypeStruct((16, 128), jnp.float32),
            grid_spec=pltpu.PrefetchScalarGridSpec(
                num_scalar_prefetch=0,
                grid=(2,),
                in_specs=[pl.BlockSpec((8, 128), lambda i: (i, 0)), const],
                out_specs=pl.BlockSpec((8, 128), lambda i: (i, 0)),
            ),
        )
        r = jax.block_until_ready(f(jnp.zeros((16, 128), jnp.float32),
                                    jnp.ones((8, 128), jnp.float32)))
        _BUFFERED1_OK = bool(jnp.allclose(r, 1.0))
    except Exception:
        _BUFFERED1_OK = False
    return _BUFFERED1_OK


# --------------------------------------------------------------------------- #
# Wrapper
# --------------------------------------------------------------------------- #
def res_block_proj(x_nchw, params, *, strides=2):
    """Forward pass of RES_BLOCK_PROJ. Input/output are NCHW like PyTorch."""
    return _res_block_proj_impl(x_nchw, params, strides=strides,
                                single_buffer_consts=_buffered1_supported())


@functools.partial(jax.jit, static_argnames=("strides", "single_buffer_consts"))
def _res_block_proj_impl(x_nchw, params, *, strides, single_buffer_consts):
    (w1, w2, w3, ws, s1, b1, s2, b2, s3, b3, ss, bs) = params
    N, Cin, H, W = x_nchw.shape
    F1 = w1.shape[1]
    F2 = w3.shape[0]
    F3 = w3.shape[1]
    Cin_p, F1_p, F2_p, F3_p = (_rup(c, 128) for c in (Cin, F1, F2, F3))

    # ---- layout plumbing (wrapper-side); cast to bf16 BEFORE moving bytes ----
    xb = x_nchw.astype(jnp.bfloat16)
    xh = jnp.transpose(xb, (0, 2, 3, 1))                  # NCHW -> NHWC
    xs = xh[:, ::strides, ::strides, :]                   # 1x1 stride-s conv == subsample
    Ho, Wo = int(xs.shape[1]), int(xs.shape[2])
    hw = Ho * Wo

    # ---- VMEM / generation-aware tiling --------------------------------------
    align = 8 // math.gcd(hw, 8)          # batch_tile multiple => bm % 8 == 0
    try:
        vmem_cap = int(pltpu.get_tpu_info().vmem_capacity_bytes)
    except Exception:
        vmem_cap = 64 * 1024 * 1024       # conservative (v7x-sized) default
    vmem_limit = (vmem_cap * 7) // 8      # headroom for runtime/internal scratch

    weight_bytes = 2 * (Cin_p * (F1_p + F3_p) + 9 * F1_p * F2_p + F2_p * F3_p)
    if not single_buffer_consts:
        weight_bytes *= 2                 # default double-buffering of constants
    # rough live bytes per flattened pixel row (inputs, output, intermediates)
    per_row = 4 * Cin_p + 14 * F1_p + 6 * F2_p + 16 * F3_p + 128
    per_row = (per_row * 5) // 4          # 25% slack
    tile_budget = max(vmem_limit - weight_bytes - (2 << 20),
                      per_row * hw * align)
    bt = max(1, tile_budget // (per_row * hw))
    if N >= 2:
        bt = min(bt, (N + 1) // 2)        # keep >=2 grid steps (megacore / pipelining)
    bt = max(align, (bt // align) * align)
    N_pad = _rup(N, bt)
    grid = (N_pad // bt,)
    bm = bt * hw
    rows = N * hw
    rows_pad = N_pad * hw
    assert bm % 8 == 0

    # ---- 2D input (flattened pixels x channels), padded, bf16 ----------------
    xs2d = xs.reshape(rows, Cin)
    xs2d = jnp.pad(xs2d, ((0, rows_pad - rows), (0, Cin_p - Cin)))

    # ---- grid-invariant per-tap validity masks (computed once, wrapper-side) -
    hh = jnp.arange(Ho)[:, None]
    ww = jnp.arange(Wo)[None, :]
    tap_cols = []
    for dy in (-1, 0, 1):
        for dx in (-1, 0, 1):
            v = ((hh + dy >= 0) & (hh + dy < Ho) &
                 (ww + dx >= 0) & (ww + dx < Wo))
            tap_cols.append(v.reshape(hw))
    m2d = jnp.stack(tap_cols, axis=1).astype(jnp.float32)     # (hw, 9)
    m2d = jnp.pad(m2d, ((0, 0), (0, 16 - 9)))                 # (hw, 16)
    m2d = jnp.tile(m2d, (N_pad, 1))                           # (rows_pad, 16)

    # ---- fold BN scales into weights, pad to 128-lane multiples, bf16 --------
    w1f = _pad2(w1 * s1, Cin_p, F1_p)
    wsf = _pad2(ws * ss, Cin_p, F3_p)
    w1s = jnp.concatenate([w1f, wsf], axis=1).astype(jnp.bfloat16)  # fused conv1|shortcut
    w3f = _pad2(w3 * s3, F2_p, F3_p).astype(jnp.bfloat16)
    w2f = w2 * s2.reshape(1, 1, F2)                                  # (9, F1, F2)
    w2f = jnp.pad(w2f, ((0, 0), (0, F1_p - F1), (0, F2_p - F2)))
    w2f = w2f.reshape(9 * F1_p, F2_p).astype(jnp.bfloat16)           # im2col layout

    b1s = jnp.concatenate([_pad2(b1, 1, F1_p), _pad2(bs, 1, F3_p)], axis=1)
    b2p = _pad2(b2, 1, F2_p)
    b3p = _pad2(b3, 1, F3_p)

    kernel = functools.partial(_res_block_proj_kernel, Wo=Wo, F1_p=F1_p)

    def const_spec(shape):
        if single_buffer_consts:
            return pl.BlockSpec(shape, lambda i: (0,) * len(shape),
                                pipeline_mode=pl.Buffered(1))
        return pl.BlockSpec(shape, lambda i: (0,) * len(shape))

    out2d = pl.pallas_call(
        kernel,
        out_shape=jax.ShapeDtypeStruct((rows_pad, F3_p), jnp.bfloat16),
        grid_spec=pltpu.PrefetchScalarGridSpec(
            num_scalar_prefetch=0,
            grid=grid,
            in_specs=[
                pl.BlockSpec((bm, Cin_p), lambda i: (i, 0)),
                pl.BlockSpec((bm, 16), lambda i: (i, 0)),
                const_spec((Cin_p, F1_p + F3_p)),
                const_spec((9 * F1_p, F2_p)),
                const_spec((F2_p, F3_p)),
                const_spec((1, F1_p + F3_p)),
                const_spec((1, F2_p)),
                const_spec((1, F3_p)),
            ],
            out_specs=pl.BlockSpec((bm, F3_p), lambda i: (i, 0)),
        ),
        compiler_params=pltpu.CompilerParams(
            dimension_semantics=("parallel",),
            vmem_limit_bytes=int(vmem_limit),
        ),
    )(xs2d, m2d, w1s, w2f, w3f, b1s, b2p, b3p)

    out = out2d[:rows, :F3].astype(jnp.float32).reshape(N, Ho, Wo, F3)
    return jnp.transpose(out, (0, 3, 1, 2))                   # NHWC -> NCHW


# --------------------------------------------------------------------------- #
# Parameter construction + pure-JAX f32 reference for validation
# --------------------------------------------------------------------------- #
def make_params(key, in_channels, filters_list):
    F1, F2, F3 = filters_list
    ks = jax.random.split(key, 16)
    eps = 1e-5

    def bn(kg, kb, km, kv, c):
        gamma = 1.0 + 0.1 * jax.random.normal(kg, (c,), jnp.float32)
        beta = 0.1 * jax.random.normal(kb, (c,), jnp.float32)
        mean = 0.1 * jax.random.normal(km, (c,), jnp.float32)
        var = jax.random.uniform(kv, (c,), jnp.float32, 0.5, 1.5)
        scale = gamma / jnp.sqrt(var + eps)
        bias = beta - mean * scale
        return scale.reshape(1, c), bias.reshape(1, c)

    # conv weights in matmul layout (in, out); conv2 taps as (9, F1, F2)
    w1 = 0.2 * jax.random.normal(ks[0], (in_channels, F1), jnp.float32)
    w2 = 0.2 * jax.random.normal(ks[1], (9, F1, F2), jnp.float32)
    w3 = 0.2 * jax.random.normal(ks[2], (F2, F3), jnp.float32)
    ws = 0.2 * jax.random.normal(ks[3], (in_channels, F3), jnp.float32)

    s1, b1 = bn(ks[4], ks[5], ks[6], ks[7], F1)
    s2, b2 = bn(ks[8], ks[9], ks[10], ks[11], F2)
    s3, b3 = bn(ks[12], ks[13], ks[14], ks[15], F3)
    ss, bs = bn(ks[7], ks[6], ks[5], ks[4], F3)  # deterministic reuse
    return (w1, w2, w3, ws, s1, b1, s2, b2, s3, b3, ss, bs)


def reference_forward(x_nchw, params, *, strides=2):
    (w1, w2, w3, ws, s1, b1, s2, b2, s3, b3, ss, bs) = params
    x = jnp.transpose(x_nchw, (0, 2, 3, 1)).astype(jnp.float32)   # NHWC
    dn = ("NHWC", "HWIO", "NHWC")

    def conv(inp, w_hwio, stride, pad):
        return lax.conv_general_dilated(
            inp, w_hwio, (stride, stride), pad, dimension_numbers=dn)

    Cin = x.shape[-1]
    F1 = w1.shape[1]; F2 = w3.shape[0]; F3 = w3.shape[1]
    w1_hwio = w1.reshape(1, 1, Cin, F1)
    w2_hwio = w2.reshape(3, 3, F1, F2)
    w3_hwio = w3.reshape(1, 1, F2, F3)
    ws_hwio = ws.reshape(1, 1, Cin, F3)

    y = conv(x, w1_hwio, strides, "VALID")
    y = jnp.maximum(y * s1.reshape(1, 1, 1, -1) + b1.reshape(1, 1, 1, -1), 0.0)
    y = conv(y, w2_hwio, 1, [(1, 1), (1, 1)])
    y = jnp.maximum(y * s2.reshape(1, 1, 1, -1) + b2.reshape(1, 1, 1, -1), 0.0)
    y = conv(y, w3_hwio, 1, "VALID")
    y = y * s3.reshape(1, 1, 1, -1) + b3.reshape(1, 1, 1, -1)

    sc = conv(x, ws_hwio, strides, "VALID")
    sc = sc * ss.reshape(1, 1, 1, -1) + bs.reshape(1, 1, 1, -1)

    out = jnp.maximum(y + sc, 0.0)
    return jnp.transpose(out, (0, 3, 1, 2))                       # NCHW


if __name__ == "__main__":
    key = jax.random.PRNGKey(0)
    kx, kp = jax.random.split(key)

    in_channels = 4
    filters_list = [8, 8, 16]
    strides = 2
    x = jax.random.normal(kx, (2, in_channels, 16, 16), jnp.float32)  # NCHW
    # The kernel computes on the MXU in bf16 with f32 accumulation; quantize the
    # input once so kernel and f32 reference see identical input values.
    x = x.astype(jnp.bfloat16).astype(jnp.float32)

    params = make_params(kp, in_channels, filters_list)

    out = jax.block_until_ready(res_block_proj(x, params, strides=strides))
    ref = jax.block_until_ready(reference_forward(x, params, strides=strides))

    assert out.shape == (2, filters_list[2], 8, 8), out.shape
    max_err = float(jnp.max(jnp.abs(out - ref)))
    assert jnp.allclose(out, ref, atol=5e-2, rtol=5e-2), max_err
    print("KERNEL_OK")
</pallas_src>

<mosaic_0001>
module attributes {stable_mosaic.version = 11 : i64} {
  func.func @k(%arg0: i32, %arg1: memref<8x128xf32, #tpu.memory_space<vmem>>, %arg2: memref<8x128xf32, #tpu.memory_space<vmem>>, %arg3: memref<8x128xf32, #tpu.memory_space<vmem>>) attributes {dimension_semantics = [#tpu.dimension_semantics<arbitrary>], iteration_bounds = array<i64: 2>, scalar_prefetch = 0 : i64, scratch_operands = 0 : i64, tpu.core_type = #tpu.core_type<tc>, window_params = [{transform_indices = @transform_0, window_bounds = array<i64: 8, 128>}, {pipeline_mode = #tpu.pipeline_mode<synchronous>, transform_indices = @transform_1, window_bounds = array<i64: 8, 128>}, {transform_indices = @transform_2, window_bounds = array<i64: 8, 128>}]} {
    %c0 = arith.constant 0 : index
    %c0_0 = arith.constant 0 : index
    %0 = vector.load %arg1[%c0, %c0_0] : memref<8x128xf32, #tpu.memory_space<vmem>>, vector<8x128xf32>
    %c0_1 = arith.constant 0 : index
    %c0_2 = arith.constant 0 : index
    %1 = vector.load %arg2[%c0_1, %c0_2] : memref<8x128xf32, #tpu.memory_space<vmem>>, vector<8x128xf32>
    %2 = arith.addf %0, %1 : vector<8x128xf32>
    %c0_3 = arith.constant 0 : index
    %c0_4 = arith.constant 0 : index
    %3 = vector.load %arg3[%c0_3, %c0_4] : memref<8x128xf32, #tpu.memory_space<vmem>>, vector<8x128xf32>
    tpu.vector_store %arg3[%c0_3, %c0_4], %2 {strides = array<i32>} : memref<8x128xf32, #tpu.memory_space<vmem>>, vector<8x128xf32>,
    return
  }
  func.func @transform_0(%arg0: i32) -> (i32, i32) {
    %c0_i32 = arith.constant 0 : i32
    %c0_i32_0 = arith.constant 0 : i32
    return %arg0, %c0_i32 : i32, i32
  }
  func.func @transform_1(%arg0: i32) -> (i32, i32) {
    %c0_i32 = arith.constant 0 : i32
    %c0_i32_0 = arith.constant 0 : i32
    %c0_i32_1 = arith.constant 0 : i32
    return %c0_i32, %c0_i32_0 : i32, i32
  }
  func.func @transform_2(%arg0: i32) -> (i32, i32) {
    %c0_i32 = arith.constant 0 : i32
    %c0_i32_0 = arith.constant 0 : i32
    return %arg0, %c0_i32 : i32, i32
  }
}

module attributes {stable_mosaic.version = 11 : i64} {
  func.func @_res_block_proj_kernel(%arg0: i32, %arg1: memref<64x128xbf16, #tpu.memory_space<vmem>>, %arg2: memref<64x16xf32, #tpu.memory_space<vmem>>, %arg3: memref<128x256xbf16, #tpu.memory_space<vmem>>, %arg4: memref<1152x128xbf16, #tpu.memory_space<vmem>>, %arg5: memref<128x128xbf16, #tpu.memory_space<vmem>>, %arg6: memref<1x256xf32, #tpu.memory_space<vmem>>, %arg7: memref<1x128xf32, #tpu.memory_space<vmem>>, %arg8: memref<1x128xf32, #tpu.memory_space<vmem>>, %arg9: memref<64x128xbf16, #tpu.memory_space<vmem>>) attributes {dimension_semantics = [#tpu.dimension_semantics<parallel>], iteration_bounds = array<i64: 2>, scalar_prefetch = 0 : i64, scratch_operands = 0 : i64, tpu.core_type = #tpu.core_type<tc>, window_params = [{transform_indices = @transform_0, window_bounds = array<i64: 64, 128>}, {transform_indices = @transform_1, window_bounds = array<i64: 64, 16>}, {pipeline_mode = #tpu.pipeline_mode<synchronous>, transform_indices = @transform_2, window_bounds = array<i64: 128, 256>}, {pipeline_mode = #tpu.pipeline_mode<synchronous>, transform_indices = @transform_3, window_bounds = array<i64: 1152, 128>}, {pipeline_mode = #tpu.pipeline_mode<synchronous>, transform_indices = @transform_4, window_bounds = array<i64: 128, 128>}, {pipeline_mode = #tpu.pipeline_mode<synchronous>, transform_indices = @transform_5, window_bounds = array<i64: 1, 256>}, {pipeline_mode = #tpu.pipeline_mode<synchronous>, transform_indices = @transform_6, window_bounds = array<i64: 1, 128>}, {pipeline_mode = #tpu.pipeline_mode<synchronous>, transform_indices = @transform_7, window_bounds = array<i64: 1, 128>}, {transform_indices = @transform_8, window_bounds = array<i64: 64, 128>}]} {
    %c0 = arith.constant 0 : index
    %c0_0 = arith.constant 0 : index
    %0 = vector.load %arg1[%c0, %c0_0] : memref<64x128xbf16, #tpu.memory_space<vmem>>, vector<64x128xbf16>
    %c0_1 = arith.constant 0 : index
    %c0_2 = arith.constant 0 : index
    %1 = vector.load %arg2[%c0_1, %c0_2] : memref<64x16xf32, #tpu.memory_space<vmem>>, vector<64x16xf32>
    %c0_3 = arith.constant 0 : index
    %c0_4 = arith.constant 0 : index
    %2 = vector.load %arg3[%c0_3, %c0_4] : memref<128x256xbf16, #tpu.memory_space<vmem>>, vector<128x256xbf16>
    %cst = arith.constant dense<0.000000e+00> : vector<64x256xf32>
    %3 = tpu.matmul %0, %2, %cst {dimension_numbers = #tpu.dot_dimension_numbers<[1], [0], [0], [1], [0, 0, 1, 1], [], []>} : vector<64x128xbf16>, vector<128x256xbf16>, vector<64x256xf32> -> vector<64x256xf32>
    %c0_5 = arith.constant 0 : index
    %c0_6 = arith.constant 0 : index
    %4 = vector.load %arg6[%c0_5, %c0_6] : memref<1x256xf32, #tpu.memory_space<vmem>>, vector<1x256xf32>
    %5 = vector.broadcast %4 : vector<1x256xf32> to vector<64x256xf32>
    %6 = arith.addf %3, %5 : vector<64x256xf32>
    %7 = vector.extract_strided_slice %6 {offsets = [0, 0], sizes = [64, 128], strides = [1, 1]} : vector<64x256xf32> to vector<64x128xf32>
    %cst_7 = arith.constant 0.000000e+00 : f32
    %8 = vector.broadcast %cst_7 : f32 to vector<64x128xf32>
    %9 = arith.maximumf %7, %8 : vector<64x128xf32>
    %10 = vector.extract_strided_slice %6 {offsets = [0, 128], sizes = [64, 128], strides = [1, 1]} : vector<64x256xf32> to vector<64x128xf32>
    %cst_8 = arith.constant 0.000000e+00 : f32
    %11 = vector.broadcast %cst_8 : f32 to vector<64x128xf32>
    %c9_i32 = arith.constant 9 : i32
    %12 = tpu.dynamic_rotate %9 by %c9_i32 dim 0 : vector<64x128xf32>, i32 -> vector<64x128xf32>
    %13 = vector.extract_strided_slice %1 {offsets = [0, 0], sizes = [64, 1], strides = [1, 1]} : vector<64x16xf32> to vector<64x1xf32>
    %14 = vector.broadcast %13 : vector<64x1xf32> to vector<64x128xf32>
    %15 = arith.mulf %12, %14 : vector<64x128xf32>
    %16 = arith.truncf %15 : vector<64x128xf32> to vector<64x128xbf16>
    %c0_9 = arith.constant 0 : index
    %c0_10 = arith.constant 0 : index
    %17 = vector.load %arg4[%c0_9, %c0_10] : memref<1152x128xbf16, #tpu.memory_space<vmem>>, vector<128x128xbf16>
    %cst_11 = arith.constant dense<0.000000e+00> : vector<64x128xf32>
    %18 = tpu.matmul %16, %17, %cst_11 {dimension_numbers = #tpu.dot_dimension_numbers<[1], [0], [0], [1], [0, 0, 1, 1], [], []>} : vector<64x128xbf16>, vector<128x128xbf16>, vector<64x128xf32> -> vector<64x128xf32>
    %19 = arith.addf %11, %18 : vector<64x128xf32>
    %c8_i32 = arith.constant 8 : i32
    %20 = tpu.dynamic_rotate %9 by %c8_i32 dim 0 : vector<64x128xf32>, i32 -> vector<64x128xf32>
    %21 = vector.extract_strided_slice %1 {offsets = [0, 1], sizes = [64, 1], strides = [1, 1]} : vector<64x16xf32> to vector<64x1xf32>
    %22 = vector.broadcast %21 : vector<64x1xf32> to vector<64x128xf32>
    %23 = arith.mulf %20, %22 : vector<64x128xf32>
    %24 = arith.truncf %23 : vector<64x128xf32> to vector<64x128xbf16>
    %c128 = arith.constant 128 : index
    %c0_12 = arith.constant 0 : index
    %25 = vector.load %arg4[%c128, %c0_12] : memref<1152x128xbf16, #tpu.memory_space<vmem>>, vector<128x128xbf16>
    %cst_13 = arith.constant dense<0.000000e+00> : vector<64x128xf32>
    %26 = tpu.matmul %24, %25, %cst_13 {dimension_numbers = #tpu.dot_dimension_numbers<[1], [0], [0], [1], [0, 0, 1, 1], [], []>} : vector<64x128xbf16>, vector<128x128xbf16>, vector<64x128xf32> -> vector<64x128xf32>
    %27 = arith.addf %19, %26 : vector<64x128xf32>
    %c7_i32 = arith.constant 7 : i32
    %28 = tpu.dynamic_rotate %9 by %c7_i32 dim 0 : vector<64x128xf32>, i32 -> vector<64x128xf32>
    %29 = vector.extract_strided_slice %1 {offsets = [0, 2], sizes = [64, 1], strides = [1, 1]} : vector<64x16xf32> to vector<64x1xf32>
    %30 = vector.broadcast %29 : vector<64x1xf32> to vector<64x128xf32>
    %31 = arith.mulf %28, %30 : vector<64x128xf32>
    %32 = arith.truncf %31 : vector<64x128xf32> to vector<64x128xbf16>
    %c256 = arith.constant 256 : index
    %c0_14 = arith.constant 0 : index
    %33 = vector.load %arg4[%c256, %c0_14] : memref<1152x128xbf16, #tpu.memory_space<vmem>>, vector<128x128xbf16>
    %cst_15 = arith.constant dense<0.000000e+00> : vector<64x128xf32>
    %34 = tpu.matmul %32, %33, %cst_15 {dimension_numbers = #tpu.dot_dimension_numbers<[1], [0], [0], [1], [0, 0, 1, 1], [], []>} : vector<64x128xbf16>, vector<128x128xbf16>, vector<64x128xf32> -> vector<64x128xf32>
    %35 = arith.addf %27, %34 : vector<64x128xf32>
    %c1_i32 = arith.constant 1 : i32
    %36 = tpu.dynamic_rotate %9 by %c1_i32 dim 0 : vector<64x128xf32>, i32 -> vector<64x128xf32>
    %37 = vector.extract_strided_slice %1 {offsets = [0, 3], sizes = [64, 1], strides = [1, 1]} : vector<64x16xf32> to vector<64x1xf32>
    %38 = vector.broadcast %37 : vector<64x1xf32> to vector<64x128xf32>
    %39 = arith.mulf %36, %38 : vector<64x128xf32>
    %40 = arith.truncf %39 : vector<64x128xf32> to vector<64x128xbf16>
    %c384 = arith.constant 384 : index
    %c0_16 = arith.constant 0 : index
    %41 = vector.load %arg4[%c384, %c0_16] : memref<1152x128xbf16, #tpu.memory_space<vmem>>, vector<128x128xbf16>
    %cst_17 = arith.constant dense<0.000000e+00> : vector<64x128xf32>
    %42 = tpu.matmul %40, %41, %cst_17 {dimension_numbers = #tpu.dot_dimension_numbers<[1], [0], [0], [1], [0, 0, 1, 1], [], []>} : vector<64x128xbf16>, vector<128x128xbf16>, vector<64x128xf32> -> vector<64x128xf32>
    %43 = arith.addf %35, %42 : vector<64x128xf32>
    %44 = arith.truncf %9 : vector<64x128xf32> to vector<64x128xbf16>
    %c512 = arith.constant 512 : index
    %c0_18 = arith.constant 0 : index
    %45 = vector.load %arg4[%c512, %c0_18] : memref<1152x128xbf16, #tpu.memory_space<vmem>>, vector<128x128xbf16>
    %cst_19 = arith.constant dense<0.000000e+00> : vector<64x128xf32>
    %46 = tpu.matmul %44, %45, %cst_19 {dimension_numbers = #tpu.dot_dimension_numbers<[1], [0], [0], [1], [0, 0, 1, 1], [], []>} : vector<64x128xbf16>, vector<128x128xbf16>, vector<64x128xf32> -> vector<64x128xf32>
    %47 = arith.addf %43, %46 : vector<64x128xf32>
    %c63_i32 = arith.constant 63 : i32
    %48 = tpu.dynamic_rotate %9 by %c63_i32 dim 0 : vector<64x128xf32>, i32 -> vector<64x128xf32>
    %49 = vector.extract_strided_slice %1 {offsets = [0, 5], sizes = [64, 1], strides = [1, 1]} : vector<64x16xf32> to vector<64x1xf32>
    %50 = vector.broadcast %49 : vector<64x1xf32> to vector<64x128xf32>
    %51 = arith.mulf %48, %50 : vector<64x128xf32>
    %52 = arith.truncf %51 : vector<64x128xf32> to vector<64x128xbf16>
    %c640 = arith.constant 640 : index
    %c0_20 = arith.constant 0 : index
    %53 = vector.load %arg4[%c640, %c0_20] : memref<1152x128xbf16, #tpu.memory_space<vmem>>, vector<128x128xbf16>
    %cst_21 = arith.constant dense<0.000000e+00> : vector<64x128xf32>
    %54 = tpu.matmul %52, %53, %cst_21 {dimension_numbers = #tpu.dot_dimension_numbers<[1], [0], [0], [1], [0, 0, 1, 1], [], []>} : vector<64x128xbf16>, vector<128x128xbf16>, vector<64x128xf32> -> vector<64x128xf32>
    %55 = arith.addf %47, %54 : vector<64x128xf32>
    %c57_i32 = arith.constant 57 : i32
    %56 = tpu.dynamic_rotate %9 by %c57_i32 dim 0 : vector<64x128xf32>, i32 -> vector<64x128xf32>
    %57 = vector.extract_strided_slice %1 {offsets = [0, 6], sizes = [64, 1], strides = [1, 1]} : vector<64x16xf32> to vector<64x1xf32>
    %58 = vector.broadcast %57 : vector<64x1xf32> to vector<64x128xf32>
    %59 = arith.mulf %56, %58 : vector<64x128xf32>
    %60 = arith.truncf %59 : vector<64x128xf32> to vector<64x128xbf16>
    %c768 = arith.constant 768 : index
    %c0_22 = arith.constant 0 : index
    %61 = vector.load %arg4[%c768, %c0_22] : memref<1152x128xbf16, #tpu.memory_space<vmem>>, vector<128x128xbf16>
    %cst_23 = arith.constant dense<0.000000e+00> : vector<64x128xf32>
    %62 = tpu.matmul %60, %61, %cst_23 {dimension_numbers = #tpu.dot_dimension_numbers<[1], [0], [0], [1], [0, 0, 1, 1], [], []>} : vector<64x128xbf16>, vector<128x128xbf16>, vector<64x128xf32> -> vector<64x128xf32>
    %63 = arith.addf %55, %62 : vector<64x128xf32>
    %c56_i32 = arith.constant 56 : i32
    %64 = tpu.dynamic_rotate %9 by %c56_i32 dim 0 : vector<64x128xf32>, i32 -> vector<64x128xf32>
    %65 = vector.extract_strided_slice %1 {offsets = [0, 7], sizes = [64, 1], strides = [1, 1]} : vector<64x16xf32> to vector<64x1xf32>
    %66 = vector.broadcast %65 : vector<64x1xf32> to vector<64x128xf32>
    %67 = arith.mulf %64, %66 : vector<64x128xf32>
    %68 = arith.truncf %67 : vector<64x128xf32> to vector<64x128xbf16>
    %c896 = arith.constant 896 : index
    %c0_24 = arith.constant 0 : index
    %69 = vector.load %arg4[%c896, %c0_24] : memref<1152x128xbf16, #tpu.memory_space<vmem>>, vector<128x128xbf16>
    %cst_25 = arith.constant dense<0.000000e+00> : vector<64x128xf32>
    %70 = tpu.matmul %68, %69, %cst_25 {dimension_numbers = #tpu.dot_dimension_numbers<[1], [0], [0], [1], [0, 0, 1, 1], [], []>} : vector<64x128xbf16>, vector<128x128xbf16>, vector<64x128xf32> -> vector<64x128xf32>
    %71 = arith.addf %63, %70 : vector<64x128xf32>
    %c55_i32 = arith.constant 55 : i32
    %72 = tpu.dynamic_rotate %9 by %c55_i32 dim 0 : vector<64x128xf32>, i32 -> vector<64x128xf32>
    %73 = vector.extract_strided_slice %1 {offsets = [0, 8], sizes = [64, 1], strides = [1, 1]} : vector<64x16xf32> to vector<64x1xf32>
    %74 = vector.broadcast %73 : vector<64x1xf32> to vector<64x128xf32>
    %75 = arith.mulf %72, %74 : vector<64x128xf32>
    %76 = arith.truncf %75 : vector<64x128xf32> to vector<64x128xbf16>
    %c1024 = arith.constant 1024 : index
    %c0_26 = arith.constant 0 : index
    %77 = vector.load %arg4[%c1024, %c0_26] : memref<1152x128xbf16, #tpu.memory_space<vmem>>, vector<128x128xbf16>
    %cst_27 = arith.constant dense<0.000000e+00> : vector<64x128xf32>
    %78 = tpu.matmul %76, %77, %cst_27 {dimension_numbers = #tpu.dot_dimension_numbers<[1], [0], [0], [1], [0, 0, 1, 1], [], []>} : vector<64x128xbf16>, vector<128x128xbf16>, vector<64x128xf32> -> vector<64x128xf32>
    %79 = arith.addf %71, %78 : vector<64x128xf32>
    %c0_28 = arith.constant 0 : index
    %c0_29 = arith.constant 0 : index
    %80 = vector.load %arg7[%c0_28, %c0_29] : memref<1x128xf32, #tpu.memory_space<vmem>>, vector<1x128xf32>
    %81 = vector.broadcast %80 : vector<1x128xf32> to vector<64x128xf32>
    %82 = arith.addf %79, %81 : vector<64x128xf32>
    %cst_30 = arith.constant 0.000000e+00 : f32
    %83 = vector.broadcast %cst_30 : f32 to vector<64x128xf32>
    %84 = arith.maximumf %82, %83 : vector<64x128xf32>
    %85 = arith.truncf %84 : vector<64x128xf32> to vector<64x128xbf16>
    %c0_31 = arith.constant 0 : index
    %c0_32 = arith.constant 0 : index
    %86 = vector.load %arg5[%c0_31, %c0_32] : memref<128x128xbf16, #tpu.memory_space<vmem>>, vector<128x128xbf16>
    %cst_33 = arith.constant dense<0.000000e+00> : vector<64x128xf32>
    %87 = tpu.matmul %85, %86, %cst_33 {dimension_numbers = #tpu.dot_dimension_numbers<[1], [0], [0], [1], [0, 0, 1, 1], [], []>} : vector<64x128xbf16>, vector<128x128xbf16>, vector<64x128xf32> -> vector<64x128xf32>
    %c0_34 = arith.constant 0 : index
    %c0_35 = arith.constant 0 : index
    %88 = vector.load %arg8[%c0_34, %c0_35] : memref<1x128xf32, #tpu.memory_space<vmem>>, vector<1x128xf32>
    %89 = vector.broadcast %88 : vector<1x128xf32> to vector<64x128xf32>
    %90 = arith.addf %87, %89 : vector<64x128xf32>
    %91 = arith.addf %90, %10 : vector<64x128xf32>
    %cst_36 = arith.constant 0.000000e+00 : f32
    %92 = vector.broadcast %cst_36 : f32 to vector<64x128xf32>
    %93 = arith.maximumf %91, %92 : vector<64x128xf32>
    %94 = arith.truncf %93 : vector<64x128xf32> to vector<64x128xbf16>
    %c0_37 = arith.constant 0 : index
    %c0_38 = arith.constant 0 : index
    %95 = vector.load %arg9[%c0_37, %c0_38] : memref<64x128xbf16, #tpu.memory_space<vmem>>, vector<64x128xbf16>
    tpu.vector_store %arg9[%c0_37, %c0_38], %94 {strides = array<i32>} : memref<64x128xbf16, #tpu.memory_space<vmem>>, vector<64x128xbf16>,
    return
  }
  func.func @transform_0(%arg0: i32) -> (i32, i32) {
    %c0_i32 = arith.constant 0 : i32
    %c0_i32_0 = arith.constant 0 : i32
    return %arg0, %c0_i32 : i32, i32
  }
  func.func @transform_1(%arg0: i32) -> (i32, i32) {
    %c0_i32 = arith.constant 0 : i32
    %c0_i32_0 = arith.constant 0 : i32
    return %arg0, %c0_i32 : i32, i32
  }
  func.func @transform_2(%arg0: i32) -> (i32, i32) {
    %c0_i32 = arith.constant 0 : i32
    %c0_i32_0 = arith.constant 0 : i32
    %c0_i32_1 = arith.constant 0 : i32
    return %c0_i32, %c0_i32_0 : i32, i32
  }
  func.func @transform_3(%arg0: i32) -> (i32, i32) {
    %c0_i32 = arith.constant 0 : i32
    %c0_i32_0 = arith.constant 0 : i32
    %c0_i32_1 = arith.constant 0 : i32
    return %c0_i32, %c0_i32_0 : i32, i32
  }
  func.func @transform_4(%arg0: i32) -> (i32, i32) {
    %c0_i32 = arith.constant 0 : i32
    %c0_i32_0 = arith.constant 0 : i32
    %c0_i32_1 = arith.constant 0 : i32
    return %c0_i32, %c0_i32_0 : i32, i32
  }
  func.func @transform_5(%arg0: i32) -> (i32, i32) {
    %c0_i32 = arith.constant 0 : i32
    %c0_i32_0 = arith.constant 0 : i32
    %c0_i32_1 = arith.constant 0 : i32
    return %c0_i32, %c0_i32_0 : i32, i32
  }
  func.func @transform_6(%arg0: i32) -> (i32, i32) {
    %c0_i32 = arith.constant 0 : i32
    %c0_i32_0 = arith.constant 0 : i32
    %c0_i32_1 = arith.constant 0 : i32
    return %c0_i32, %c0_i32_0 : i32, i32
  }
  func.func @transform_7(%arg0: i32) -> (i32, i32) {
    %c0_i32 = arith.constant 0 : i32
    %c0_i32_0 = arith.constant 0 : i32
    %c0_i32_1 = arith.constant 0 : i32
    return %c0_i32, %c0_i32_0 : i32, i32
  }
  func.func @transform_8(%arg0: i32) -> (i32, i32) {
    %c0_i32 = arith.constant 0 : i32
    %c0_i32_0 = arith.constant 0 : i32
    return %arg0, %c0_i32 : i32, i32
  }
}

</mosaic_0001>

<bundles_post_ra>
// kernel: tpu_custom_call.1
= control target key start
LH: loop header
LB: loop body
LE: loop exit
PB: predicated region body
PF: predicated region fallthrough
CT: control target
= control target key end

     0   :  { %7 = vsyncpa [#allocation3], 0  ;;  %s649_s0 = inlined_call_operand.hbm [shape: f32[16,128], index: 0, kind: input, shape index: {}]   ;;  %s650_s1 = inlined_call_operand.hbm [shape: f32[8,128], index: 1, kind: input, shape index: {}]   ;;  %s651_s2 = inlined_call_operand.hbm [shape: f32[16,128], index: 2, kind: output, shape index: {}]  }
   0x1   :  { %9 = vsyncpa [#allocation3 + $0x1], 0 }
   0x2   :  { %10 = vsyncpa [#allocation6], 0 }
   0x3   :  { %11 = vsyncpa [#allocation4], 0 }
   0x4   :  { %13 = vsyncpa [#allocation4 + $0x1], 0  ;;  %s483_s9 = smov 0   ;;  %s485_s10 = smov 0  }
   0x5   :  { %s487_s11 = smov 0   ;;  %s489_s12 = smov 0  }
   0x6 LB: > { %s504_s13 = sadd.s32 4294967295, %s463_s12   ;;  %s270_s14 = sadd.s32 4294967294, %s463_s12   ;;  %s463_s12 = sphi %s489_s12, %s674_s12   ;;  %s459_s11 = sphi %s487_s11, %s673_s11   ;;  %s455_s10 = sphi %s485_s10, %s672_s10   ;;  %s451_s9 = sphi %s483_s9, %s671_s9  }
   0x7   : > { %p39_p0 = scmp.ne.s32.totalorder %s455_s10, %s451_s9  ;;  %p652_p1 = scmp.eq.s32.totalorder %s504_s13, 0 }
   0x8   : > { %p90_p3 = scmp.eq.s32.totalorder %s270_s14, 1  ;;  %p271_p5 = scmp.ge.s32.totalorder %s463_s12, 1 }
   0x9   : > { %p513_p4 = por %p652_p1, %p39_p0  ;;  %p97_p7 = scmp.lt.s32.totalorder %s463_s12, 3 }
   0xa   : > { %p518_p6 = por %p90_p3, %p39_p0  ;;  %s465_s18 = smov [#allocation5]  }
   0xb   : > { %s656_s15 = scalar_select %p513_p4, 1, 0 }
   0xc   : > { %s657_s16 = scalar_select %p518_p6, 1, 0 }
   0xd   : > { %p523_p8 = pnand %p271_p5, %p97_p7  ;;  %s110_s19 = sshll.u32 %s465_s18, 4  ;;  %s111_s19 = int_to_ptr.vmem [resolvable:$true] %s110_s19 }
   0xe   : > { %s531_s20 = sadd.s32 1, %s463_s12   ;;  %s26_s24 = sadd.s32 1, %s459_s11 }
   0xf   : > { %s658_s17 = scalar_select %p523_p8, 1, 0 }
  0x10   : > { %p292_p10 = pneg %p523_p8  ;;  %s23_s22 = ssub.s32 %s463_s12, %s531_s20 }
  0x11   : > { %p541_p12 = scmp.eq.s32.totalorder %s23_s22, 0  ;;  %p33_p13 = scmp.ne.s32.totalorder %s459_s11, %s455_s10 }
  0x12   : > { %p535_p11 = pnand %p292_p10, %p652_p1  ;;  %s352_s25 = scalar_lea.vmem %s111_s19, 128 }
  0x13   : > { %p353_p3 = scmp.ne.s32.totalorder %s111_s19, %s352_s25  ;;  %p360_p9 = scmp.lt.s32.totalorder %s111_s19, %s111_s19 }
  0x14   : > { %p343_p0 = pneg %p535_p11  ;;  %p361_p2 = scmp.lt.s32.totalorder %s352_s25, %s352_s25 }
  0x16   : > { %p355_p5 = pnand %p353_p3, %p343_p0  ;;  %p362_p10 = por %p361_p2, %p360_p9 }
  0x18   : > { %p356_p7 = pneg %p355_p5 }
  0x1a   : > { %p363_p1 = pnand %p362_p10, %p356_p7 }
  0x1c   : > { %366 = shalt.err (!%p363_p1)
}
  0x1d   : > { %295 = dma.hbm_to_vmem [thread:$0]  (!%p535_p11), %s650_s1, 128, %s111_s19, [#allocation6]  }
  0x1e   : > { %s558_s28 = scalar_select %p541_p12, %s459_s11, %s26_s24  }
  0x1f   : > { %p34_p1 = scmp.eq.s32.totalorder %s463_s12, 0  ;;  %p661_p2 = scmp.eq.s32.totalorder %s504_s13, 1 }
  0x20   : > { %p305_p0 = scmp.lt.s32.totalorder %s463_s12, 2  ;;  %s121_s30 = sand.u32 1, %s459_s11  }
  0x21   : > { %p566_p9 = por %p661_p2, %p33_p13  ;;  %p35_p3 = por %p34_p1, %p33_p13 }
  0x22   : > { %s274_s3 = sshll.u32 %s121_s30, 3  ;;  %s275_s4 = sshll.u32 %s463_s12, 7 }
  0x23   : > { %s662_s29 = scalar_select %p566_p9, 1, 0 }
  0x24   : > { %s579_s7 = scalar_lea.hbm %s649_s0, %s275_s4  ;;  %s125_s8 = scalar_lea.vmem [#allocation2], %s274_s3 }
  0x25   : > { %s132_s14 = sshll.u32 %s125_s8, 4  ;;  %p581_p11 = pnand %p305_p0, %p35_p3  ;;  %s133_s14 = int_to_ptr.vmem [resolvable:$true] %s132_s14 }
  0x26   : > { %s122_s19 = scalar_lea.sflag [#allocation3], %s121_s30  ;;  %s367_s21 = scalar_lea.hbm %s579_s7, 128 }
  0x27   : > { %p368_p12 = scmp.ne.s32.totalorder %s579_s7, %s367_s21  ;;  %p369_p13 = pneg %p581_p11 }
  0x28   : > { %s372_s24 = scalar_lea.hbm %s649_s0, 256  ;;  %p373_p10 = scmp.lt.s32.totalorder %s579_s7, %s649_s0 }
  0x29   : > { %p370_p5 = pnand %p369_p13, %p368_p12  ;;  %p374_p1 = scmp.lt.s32.totalorder %s372_s24, %s367_s21 }
  0x2b   : > { %p371_p7 = pneg %p370_p5  ;;  %p375_p2 = por %p374_p1, %p373_p10 }
  0x2d   : > { %p376_p0 = pnand %p375_p2, %p371_p7 }
  0x2f   : > { %379 = shalt.err (!%p376_p0)
}
  0x30   : > { %s380_s27 = scalar_lea.vmem %s133_s14, 128  ;;  %s466_s30 = smov [#allocation2]  }
  0x31   : > { %p381_p3 = scmp.ne.s32.totalorder %s133_s14, %s380_s27  ;;  %s385_s3 = sshll.u32 %s466_s30, 4  ;;  %s386_s3 = int_to_ptr.vmem [resolvable:$false] %s385_s3 }
  0x32   : > { %s387_s4 = scalar_lea.vmem %s386_s3, 256  ;;  %p388_p12 = scmp.lt.s32.totalorder %s133_s14, %s386_s3 }
  0x33   : > { %p383_p6 = pnand %p381_p3, %p369_p13  ;;  %p389_p5 = scmp.lt.s32.totalorder %s387_s4, %s380_s27 }
  0x35   : > { %p384_p9 = pneg %p383_p6  ;;  %p390_p4 = por %p389_p5, %p388_p12 }
  0x37   : > { %p391_p8 = pnand %p390_p4, %p384_p9 }
  0x39   : > { %394 = shalt.err (!%p391_p8)
}
  0x3a   : > { %299 = dma.hbm_to_vmem [thread:$0]  (!%p581_p11), %s579_s7, 128, %s133_s14, %s122_s19  }
  0x3b   : > { %p664_p7 = scmp.ne.s32.totalorder %s658_s17, 0 }
  0x3c   : > { %s602_s5 = sand.u32 (!%p664_p7), 1, %s455_s10   ;;  %p665_p6 = scmp.ne.s32.totalorder (!%p664_p7), %s656_s15, 0 }
  0x3d   : > { %141 = sbr.rel (%p664_p7) target bundleno = 95 (0x5f), region = 28  ;;  %s277_s6 = sshll.u32 (!%p664_p7), %s602_s5, 3 }
  0x3e   : > { %s144_s8 = scalar_lea.sflag (!%p664_p7), [#allocation3], %s602_s5  ;;  %s147_s21 = scalar_lea.vmem (!%p664_p7), [#allocation2], %s277_s6 }
  0x42   : > { %438 = dma.done.wait (%p665_p6), %s144_s8, 128  }
  0x43   : > { %440 = vsyncadd (%p665_p6), %s144_s8, 4294967168  ;;  %p666_p4 = scmp.eq.s32.totalorder %s504_s13, 0 }
  0x45   : > { %442 = dma.done.wait (%p666_p4), [#allocation6], 128   ;;  %p667_p8 = pmov %p666_p4 }
  0x46   : > { %s171_s17 = scalar_lea.vmem [#allocation7], %s277_s6  ;;  %s281_s14 = sshll.u32 %s504_s13, 7  ;;  %v172_v0 = vld [vmem:[%s147_s21] sm:$0xff]  ;;  %v173_v1 = vld [vmem:[#allocation5] sm:$0xff] }
  0x47   : > { %444 = vsyncadd (%p667_p8), [#allocation6], 4294967168  ;;  %s190_s7 = sshll.u32 %s171_s17, 4  ;;  %v174_v2 = vadd.f32 %v173_v1, %v172_v0  ;;  %s188_s15 = scalar_lea.hbm %s651_s2, %s281_s14  ;;  %s191_s7 = int_to_ptr.vmem [resolvable:$true] %s190_s7 }
  0x48   : > { %s177_s22 = scalar_lea.sflag [#allocation4], %s602_s5  ;;  %s395_s23 = scalar_lea.vmem %s191_s7, 128 }
  0x49   : > { %175 = vst [vmem:[%s171_s17] sm:$0xff] %v174_v2  ;;  %p396_p9 = scmp.ne.s32.totalorder %s191_s7, %s395_s23  ;;  %p668_p11 = scmp.ne.s32.totalorder %s662_s29, 0 }
  0x4a   : > { %s467_s24 = smov [#allocation7]  }
  0x4b   : > { %p397_p13 = pnand %p396_p9, %p668_p11  ;;  %s399_s25 = sshll.u32 %s467_s24, 4  ;;  %s400_s25 = int_to_ptr.vmem [resolvable:$false] %s399_s25 }
  0x4c   : > { %s401_s26 = scalar_lea.vmem %s400_s25, 256  ;;  %p402_p1 = scmp.lt.s32.totalorder %s191_s7, %s400_s25 }
  0x4d   : > { %p398_p10 = pneg %p397_p13  ;;  %p403_p2 = scmp.lt.s32.totalorder %s401_s26, %s395_s23 }
  0x4f   : > { %p404_p0 = por %p403_p2, %p402_p1 }
  0x51   : > { %p405_p3 = pnand %p404_p0, %p398_p10 }
  0x53   : > { %408 = shalt.err (!%p405_p3)
}
  0x54   : > { %s409_s13 = scalar_lea.hbm %s188_s15, 128  ;;  %s413_s3 = scalar_lea.hbm %s651_s2, 256 }
  0x55   : > { %p410_p12 = scmp.ne.s32.totalorder %s188_s15, %s409_s13  ;;  %p414_p6 = scmp.lt.s32.totalorder %s188_s15, %s651_s2 }
  0x56   : > { %p415_p4 = scmp.lt.s32.totalorder %s413_s3, %s409_s13 }
  0x57   : > { %p411_p5 = pnand %p410_p12, %p668_p11 }
  0x58   : > { %p416_p8 = por %p415_p4, %p414_p6 }
  0x59   : > { %p412_p7 = pneg %p411_p5 }
  0x5b   : > { %p417_p9 = pnand %p416_p8, %p412_p7 }
  0x5d   : > { %420 = shalt.err (!%p417_p9)
}
  0x5e   : > { %290 = dma.vmem_to_hbm [thread:$0]  (%p668_p11), %s191_s7, 128, %s188_s15, %s177_s22  }
  0x5f PF: > { %s202_s6 = sand.u32 1, %s451_s9   ;;  %p669_p13 = scmp.ne.s32.totalorder %s657_s16, 0 }
  0x60   : > { %p670_p10 = scmp.ge.s32.totalorder %s463_s12, 2  ;;  %s203_s8 = scalar_lea.sflag [#allocation4], %s202_s6 }
  0x62   : > { %p301_p1 = pnand %p670_p10, %p669_p13 }
  0x64   : > { %p302_p2 = pneg %p301_p1 }
  0x66   : > { %446 = dma.done.wait (%p302_p2), %s203_s8, 128  }
  0x67   : > { %448 = vsyncadd (%p302_p2), %s203_s8, 4294967168  ;;  %p16_p0 = scmp.ge.s32.totalorder %s531_s20, 4   ;;  %s671_s9 = smov %s455_s10 }
  0x68   : > { %s672_s10 = smov %s459_s11  ;;  %s673_s11 = smov %s558_s28 }
  0x69   : > { %s674_s12 = smov %s531_s20  ;;  %18 = sbr.rel (!%p16_p0) target bundleno = 6 (0x6), region = 77 }
  0x6e   :  { %208 = vsyncpa [#allocation3], 1 }
  0x6f   :  { %210 = vsyncpa [#allocation3 + $0x1], 1 }
  0x70   :  { %211 = vsyncpa [#allocation6], 1 }
  0x71   :  { %212 = vsyncpa [#allocation4], 1 }
  0x72   :  { %214 = vsyncpa [#allocation4 + $0x1], 1 }

// kernel: _res_block_proj_impl.1
= control target key start
LH: loop header
LB: loop body
LE: loop exit
PB: predicated region body
PF: predicated region fallthrough
CT: control target
= control target key end

     0   :  { %s3204_s27 = smov 0   ;;  %s4148_s0 = inlined_call_operand.vmem [shape: bf16[128,128], index: 0, kind: input, shape index: {}]   ;;  %s4149_s1 = inlined_call_operand.vmem [shape: f32[128,16], index: 1, kind: input, shape index: {}]   ;;  %s4150_s2 = inlined_call_operand.vmem [shape: bf16[128,256], index: 2, kind: input, shape index: {}]   ;;  %s4151_s3 = inlined_call_operand.vmem [shape: bf16[1152,128], index: 3, kind: input, shape index: {}]   ;;  %s4152_s4 = inlined_call_operand.vmem [shape: bf16[128,128], index: 4, kind: input, shape index: {}]   ;;  %s4153_s5 = inlined_call_operand.vmem [shape: f32[1,256], index: 5, kind: input, shape index: {}]   ;;  %s4154_s6 = inlined_call_operand.vmem [shape: f32[1,128], index: 6, kind: input, shape index: {}]   ;;  %s4155_s7 = inlined_call_operand.vmem [shape: f32[1,128], index: 7, kind: input, shape index: {}]   ;;  %s4156_s8 = inlined_call_operand.vmem [shape: bf16[128,128], index: 8, kind: output, shape index: {}]  }
   0x1 LB: > { %s2465_s28 = sadd.s32 4294967295, %s3149_s27   ;;  %p2469_p0 = scmp.ge.s32.totalorder %s3149_s27, 1  ;;  %s3149_s27 = sphi %s3204_s27, %s18_s27  }
   0x2   : > { %p274_p1 = scmp.lt.s32.totalorder %s3149_s27, 3 }
   0x4   : > { %p275_p2 = pnand %p2469_p0, %p274_p1 }
   0x6   : > { %278 = sbr.rel (%p275_p2) target bundleno = 827 (0x33b), region = 52 }
   0xb   : > { %v3035_v0 = vld [vmem:[%s4150_s2 + $0x74] ss:$8 sps:$4 sm:$0xff]   ;;  %s2470_s9 = sshll.u32 %s2465_s28, 3  ;;  %v3037_v1 = vld [vmem:[%s4150_s2 + $0x70] ss:$8 sps:$4 sm:$0xff]   ;;  %v3151_v2 = vmov 1   ;;  %v366_v34 = vlaneseq }
   0xc   : > { %3012 = vset.pattern.permute.xlu1 %v3151_v2  ;;  %3011 = vset.pattern.permute.xlu0 %v3151_v2  ;;  %p314_p3 = scmp.lt.s32.totalorder %s2470_s9, 15  ;;  %v3038_v3 = vld [vmem:[%s4150_s2 + $0x64] ss:$8 sps:$4 sm:$0xff]   ;;  %v3152_v4 = vmov 0   ;;  %v3040_v5 = vld [vmem:[%s4150_s2 + $0x60] ss:$8 sps:$4 sm:$0xff]  }
   0xd   : > { %480 = vmatprep.subr.bf16.mxu0 %v3035_v0  ;;  %512 = vmatprep.mubr.bf16.mxu0 %v3152_v4  ;;  %v3041_v6 = vld [vmem:[%s4150_s2 + $0x54] ss:$8 sps:$4 sm:$0xff]   ;;  %v3043_v9 = vld [vmem:[%s4150_s2 + $0x50] ss:$8 sps:$4 sm:$0xff]   ;;  %v3044_v10 = vld [vmem:[%s4150_s2 + $0x44] ss:$8 sps:$4 sm:$0xff]  }
   0xe   : > { %481 = vmatpush1.bf16.msra.mxu0 %v3037_v1  ;;  %s4245_s9 = smov (!%p314_p3, %s2470_s9), 15  ;;  %v3046_v13 = vld [vmem:[%s4150_s2 + $0x40] ss:$8 sps:$4 sm:$0xff]   ;;  %v3047_v14 = vld [vmem:[%s4150_s2 + $0x34] ss:$8 sps:$4 sm:$0xff]   ;;  %v3153_v27 = vmov 2  }
   0xf   : > { %482 = vmatprep.subr.bf16.mxu0 %v3038_v3  ;;  %s2473_s16 = sshll.u32 %s4245_s9, 3  ;;  %s2471_s26 = sshll.u32 %s4245_s9, 2  ;;  %v3049_v17 = vld [vmem:[%s4150_s2 + $0x30] ss:$8 sps:$4 sm:$0xff]   ;;  %v3050_v20 = vld [vmem:[%s4150_s2 + $0x24] ss:$8 sps:$4 sm:$0xff]  }
  0x10   : > { %s323_s21 = scalar_lea.vmem %s4149_s1, %s2473_s16  ;;  %s3266_s13 = scalar_lea.vmem %s4148_s0, %s2471_s26  ;;  %v3052_v21 = vld [vmem:[%s4150_s2 + $0x20] ss:$8 sps:$4 sm:$0xff]   ;;  %v3053_v22 = vld [vmem:[%s4150_s2 + $0x14] ss:$8 sps:$4 sm:$0xff]   ;;  %v3055_v23 = vld [vmem:[%s4150_s2 + $0x10] ss:$8 sps:$4 sm:$0xff]  }
  0x11   : > { %v3234_v7 = vld [vmem:[%s323_s21 + $0x10] sm:$0xff]  ;;  %v3236_v8 = vld [vmem:[%s323_s21] sm:$0xff]  ;;  %v3246_v11 = vld [vmem:[%s323_s21 + $0x18] sm:$0xff]  ;;  %v3154_v30 = vmov 3   ;;  %v3155_v32 = vmov 5   ;;  %v3156_v33 = vmov 6   ;;  %s329_s25 = scalar_lea.vmem %s4156_s8, %s2471_s26 }
  0x12   : > { %483 = vmatpush1.bf16.msra.mxu0 %v3040_v5  ;;  %657 = vperm.xlu1 %3012, %v3234_v7   ;;  %v3248_v12 = vld [vmem:[%s323_s21 + $0x8] sm:$0xff]  ;;  %v3268_v16 = vld [vmem:[%s323_s21 + $0x20] sm:$0xff]  ;;  %v3273_v18 = vld [vmem:[%s323_s21 + $0x38] sm:$0xff]  ;;  %v3157_v35 = vmov 7   ;;  %v3345_v36 = vshrl.u32 %v366_v34, 7  ;;  %v3158_v41 = vmov 8  }
  0x13   : > { %649 = vperm.xlu0 %3011, %v3236_v8   ;;  %484 = vmatprep.subr.bf16.mxu0 %v3041_v6  ;;  %v3259_v15 = vld [vmem:[%s323_s21 + $0x28] sm:$0xff]  ;;  %v3275_v19 = vld [vmem:[%s323_s21 + $0x30] sm:$0xff]  ;;  %v3059_v26 = vld [vmem:[%s3266_s13] sm:$0xff]  }
  0x14   : > { %v3056_v24 = vld [vmem:[%s4150_s2 + $0x4] ss:$8 sps:$4 sm:$0xff]   ;;  %v3058_v25 = vld [vmem:[%s4150_s2] ss:$8 sps:$4 sm:$0xff]   ;;  %v3061_v29 = vld [vmem:[%s3266_s13 + $0x10] sm:$0xff]   ;;  %v372_v37 = vsub.s32 1, %v3345_v36 }
  0x15   : > { %v3060_v28 = vld [vmem:[%s3266_s13 + $0x8] sm:$0xff]   ;;  %v3062_v31 = vld [vmem:[%s3266_s13 + $0x18] sm:$0xff]   ;;  %v3352_v38 = vld [vmem:[%s4153_s5] sm:$0x3]  ;;  %vm942_vm0 = vcmp.lt.s32.totalorder %v3345_v36, 7  ;;  %vm571_vm1 = vcmp.lt.s32.totalorder %v3345_v36, 1 }
  0x16   : > { %485 = vmatpush1.bf16.msra.mxu0 %v3043_v9  ;;  %661 = vperm.xlu1 %3012, %v3246_v11   ;;  %v3356_v39 = vrot.slane %v3352_v38, %v372_v37  ;;  %v3063_v40 = vld [vmem:[%s4151_s3 + $0x78] sm:$0xff]   ;;  %v3065_v43 = vld [vmem:[%s4151_s3 + $0x70] sm:$0xff]   ;;  %v3067_v45 = vld [vmem:[%s4151_s3 + $0x68] sm:$0xff]  }
  0x17   : > { %653 = vperm.xlu0 %3011, %v3248_v12   ;;  %486 = vmatprep.subr.bf16.mxu0 %v3044_v10  ;;  %v3064_v42 = vld [vmem:[%s4151_s3 + $0x38] sm:$0xff]   ;;  %v3066_v44 = vld [vmem:[%s4151_s3 + $0x30] sm:$0xff]   ;;  %v3068_v46 = vld [vmem:[%s4151_s3 + $0x28] sm:$0xff]  }
  0x18   : > { %4162 = vst [vmem:[#allocation2_spill] sm:$0xff] %v3356_v39  ;;  %2739 = vmatprep.subr.bf16.mxu1 %v3063_v40  ;;  %v3069_v47 = vld [vmem:[%s4151_s3 + $0x60] sm:$0xff]   ;;  %v3071_v49 = vld [vmem:[%s4151_s3 + $0x58] sm:$0xff]   ;;  %v3073_v51 = vld [vmem:[%s4151_s3 + $0x50] sm:$0xff]  }
  0x19   : > { %2740 = vmatpush3.bf16.msra.mxu1 %v3063_v40  ;;  %v3070_v48 = vld [vmem:[%s4151_s3 + $0x20] sm:$0xff]   ;;  %v3072_v50 = vld [vmem:[%s4151_s3 + $0x18] sm:$0xff]   ;;  %v3074_v52 = vld [vmem:[%s4151_s3 + $0x10] sm:$0xff]  }
  0x1a   : > { %487 = vmatpush1.bf16.msra.mxu0 %v3046_v13  ;;  %669 = vperm.xlu1 %3012, %v3259_v15   ;;  %v3075_v53 = vld [vmem:[%s4151_s3 + $0x48] sm:$0xff]   ;;  %v3077_v55 = vld [vmem:[%s4151_s3 + $0x40] sm:$0xff]   ;;  %v3427_v59 = vld [vmem:[%s4151_s3 + $0xb8] sm:$0xff]  }
  0x1b   : > { %665 = vperm.xlu0 %3011, %v3268_v16   ;;  %488 = vmatprep.subr.bf16.mxu0 %v3047_v14  ;;  %v3076_v54 = vld [vmem:[%s4151_s3 + $0x8] sm:$0xff]   ;;  %v3078_v58 = vld [vmem:[%s4151_s3] sm:$0xff]   ;;  %v3438_v62 = vld [vmem:[%s4151_s3 + $0xf8] sm:$0xff]  }
  0x1c   : > { %2741 = vmatprep.subr.bf16.mxu1 %v3065_v43 }
  0x1d   : > { %2742 = vmatpush3.bf16.msra.mxu1 %v3065_v43 }
  0x1e   : > { %489 = vmatpush1.bf16.msra.mxu0 %v3049_v17  ;;  %677 = vperm.xlu1 %3012, %v3273_v18  }
  0x1f   : > { %673 = vperm.xlu0 %3011, %v3275_v19   ;;  %490 = vmatprep.subr.bf16.mxu0 %v3050_v20 }
  0x20   : > { %2743 = vmatprep.subr.bf16.mxu1 %v3067_v45 }
  0x21   : > { %2744 = vmatpush3.bf16.msra.mxu1 %v3067_v45  ;;  %v368_v45 = vsub.s32 0, %v3345_v36 }
  0x22   : > { %491 = vmatpush1.bf16.msra.mxu0 %v3052_v21  ;;  %3014 = vset.pattern.permute.xlu1 %v3152_v4 }
  0x23   : > { %3013 = vset.pattern.permute.xlu0 %v3152_v4  ;;  %587 = vperm.xlu1 %3014, %v3248_v12  }
  0x24   : > { %582 = vperm.xlu0 %3013, %v3236_v8   ;;  %492 = vmatprep.subr.bf16.mxu0 %v3053_v22 }
  0x25   : > { %2745 = vmatprep.subr.bf16.mxu1 %v3069_v47 }
  0x26   : > { %493 = vmatpush1.bf16.msra.mxu0 %v3055_v23  ;;  %2746 = vmatpush3.bf16.msra.mxu1 %v3069_v47 }
  0x27   : > { %494 = vmatprep.subr.bf16.mxu0 %v3056_v24  ;;  %592 = vperm.xlu1 %3014, %v3234_v7  }
  0x28   : > { %597 = vperm.xlu0 %3013, %v3246_v11   ;;  %2747 = vmatprep.subr.bf16.mxu1 %v3071_v49 }
  0x2a   : > { %495 = vmatpush1.bf16.msra.mxu0 %v3058_v25  ;;  %2748 = vmatpush3.bf16.msra.mxu1 %v3071_v49 }
  0x2b   : > { %3015 = vset.pattern.permute.xlu1 %v3153_v27  ;;  %2763 = vmatprep.subr.bf16.mxu0 %v3064_v42 }
  0x2c   : > { %3016 = vset.pattern.permute.xlu0 %v3153_v27  ;;  %952 = vperm.xlu1 %3015, %v3236_v8  }
  0x2d   : > { %956 = vperm.xlu0 %3016, %v3248_v12   ;;  %513 = vmatmul.mubr.bf16.vlgmr.msra.gmra.mxu0 %v3059_v26 }
  0x2e   : > { %522 = vmatprep.mubr.bf16.mxu0 %v3152_v4  ;;  %2764 = vmatpush3.bf16.msra.mxu0 %v3064_v42 }
  0x2f   : > { %2765 = vmatprep.subr.bf16.mxu0 %v3066_v44  ;;  %2749 = vmatprep.subr.bf16.mxu1 %v3073_v51 }
  0x30   : > { %960 = vperm.xlu1 %3015, %v3234_v7   ;;  %2750 = vmatpush3.bf16.msra.mxu1 %v3073_v51 }
  0x31   : > { %3017 = vset.pattern.permute.xlu0 %v3152_v4  ;;  %2751 = vmatprep.subr.bf16.mxu1 %v3075_v53 }
  0x32   : > { %602 = vperm.xlu0 %3017, %v3268_v16   ;;  %2766 = vmatpush3.bf16.msra.mxu0 %v3066_v44 }
  0x33   : > { %2767 = vmatprep.subr.bf16.mxu0 %v3068_v46 }
  0x34   : > { %964 = vperm.xlu1 %3015, %v3246_v11   ;;  %2752 = vmatpush3.bf16.msra.mxu1 %v3075_v53 }
  0x35   : > { %523 = vmatmul.mubr.bf16.gmra.mxu0 %v3060_v28  ;;  %2753 = vmatprep.subr.bf16.mxu1 %v3077_v55 }
  0x36   : > { %617 = vperm.xlu0 %3017, %v3273_v18   ;;  %532 = vmatprep.mubr.bf16.mxu0 %v3152_v4 }
  0x37   : > { %2768 = vmatpush3.bf16.msra.mxu0 %v3068_v46 }
  0x38   : > { %3018 = vset.pattern.permute.xlu1 %v3152_v4  ;;  %2769 = vmatprep.subr.bf16.mxu0 %v3070_v48 }
  0x39   : > { %607 = vperm.xlu1 %3018, %v3259_v15   ;;  %2754 = vmatpush3.bf16.msra.mxu1 %v3077_v55 }
  0x3a   : > { %3020 = vset.pattern.permute.xlu0 %v3153_v27  ;;  %2787 = vmatprep.subr.bf16.mxu1 %v3427_v59 }
  0x3b   : > { %972 = vperm.xlu0 %3020, %v3259_v15   ;;  %2770 = vmatpush3.bf16.msra.mxu0 %v3070_v48 }
  0x3c   : > { %2771 = vmatprep.subr.bf16.mxu0 %v3072_v50 }
  0x3d   : > { %612 = vperm.xlu1 %3018, %v3275_v19   ;;  %533 = vmatmul.mubr.bf16.gmra.mxu0 %v3061_v29 }
  0x3e   : > { %542 = vmatprep.mubr.bf16.mxu0 %v3152_v4 }
  0x3f   : > { %3021 = vset.pattern.permute.xlu0 %v3154_v30  ;;  %2772 = vmatpush3.bf16.msra.mxu0 %v3072_v50  ;;  %v369_v50 = vrot.slane %v3352_v38, %v368_v45 }
  0x40   : > { %1133 = vperm.xlu0 %3021, %v3236_v8   ;;  %2773 = vmatprep.subr.bf16.mxu0 %v3074_v52 }
  0x41   : > { %3019 = vset.pattern.permute.xlu1 %v3153_v27 }
  0x42   : > { %968 = vperm.xlu1 %3019, %v3268_v16  }
  0x43   : > { %2774 = vmatpush3.bf16.msra.mxu0 %v3074_v52 }
  0x44   : > { %1145 = vperm.xlu0 %3021, %v3246_v11   ;;  %2775 = vmatprep.subr.bf16.mxu0 %v3076_v54 }
  0x45   : > { %543 = vmatmul.mubr.bf16.gmra.mxu0 %v3062_v31 }
  0x46   : > { %976 = vperm.xlu1 %3019, %v3275_v19  }
  0x47   : > { %2776 = vmatpush3.bf16.msra.mxu0 %v3076_v54 }
  0x48   : > { %1153 = vperm.xlu0 %3021, %v3259_v15   ;;  %2777 = vmatprep.subr.bf16.mxu0 %v3078_v58 }
  0x4a   : > { %980 = vperm.xlu1 %3019, %v3273_v18  }
  0x4b   : > { %2778 = vmatpush3.bf16.msra.mxu0 %v3078_v58 }
  0x4c   : > { %1161 = vperm.xlu0 %3021, %v3273_v18   ;;  %2811 = vmatprep.subr.bf16.mxu0 %v3438_v62 }
  0x4e   : > { %3022 = vset.pattern.permute.xlu1 %v3154_v30 }
  0x4f   : > { %1137 = vperm.xlu1 %3022, %v3248_v12  }
  0x50   : > { %3024 = vset.pattern.permute.xlu0 %v3155_v32 }
  0x51   : > { %1459 = vperm.xlu0 %3024, %v3248_v12  }
  0x53   : > { %1141 = vperm.xlu1 %3022, %v3234_v7  }
  0x55   : > { %1475 = vperm.xlu0 %3024, %v3259_v15  }
  0x57   : > { %1149 = vperm.xlu1 %3022, %v3268_v16  }
  0x59   : > { %3027 = vset.pattern.permute.xlu0 %v3156_v33 }
  0x5a   : > { %1636 = vperm.xlu0 %3027, %v3236_v8  }
  0x5b   : > { %1157 = vperm.xlu1 %3022, %v3275_v19  }
  0x5e   : > { %1648 = vperm.xlu0 %3027, %v3246_v11  }
  0x5f   : > { %3023 = vset.pattern.permute.xlu1 %v3155_v32 }
  0x60   : > { %1455 = vperm.xlu1 %3023, %v3236_v8  }
  0x62   : > { %1652 = vperm.xlu0 %3027, %v3268_v16  }
  0x64   : > { %1463 = vperm.xlu1 %3023, %v3234_v7  }
  0x66   : > { %1664 = vperm.xlu0 %3027, %v3273_v18  }
  0x68   : > { %1467 = vperm.xlu1 %3023, %v3246_v11  }
  0x6a   : > { %3030 = vset.pattern.permute.xlu0 %v3157_v35 }
  0x6b   : > { %1821 = vperm.xlu0 %3030, %v3248_v12  }
  0x6c   : > { %3025 = vset.pattern.permute.xlu1 %v3156_v33 }
  0x6d   : > { %1640 = vperm.xlu1 %3025, %v3248_v12  }
  0x6f   : > { %1837 = vperm.xlu0 %3030, %v3259_v15  }
  0x71   : > { %1644 = vperm.xlu1 %3025, %v3234_v7  }
  0x73   : > { %3033 = vset.pattern.permute.xlu0 %v3158_v41 }
  0x74   : > { %1998 = vperm.xlu0 %3033, %v3236_v8  }
  0x75   : > { %3026 = vset.pattern.permute.xlu1 %v3155_v32 }
  0x76   : > { %1471 = vperm.xlu1 %3026, %v3268_v16  }
  0x78   : > { %2010 = vperm.xlu0 %3033, %v3246_v11  }
  0x7a   : > { %1479 = vperm.xlu1 %3026, %v3275_v19  }
  0x7c   : > { %2014 = vperm.xlu0 %3033, %v3268_v16  }
  0x7e   : > { %1483 = vperm.xlu1 %3026, %v3273_v18  }
  0x80   : > { %2026 = vperm.xlu0 %3033, %v3273_v18  }
  0x82   : > { %3028 = vset.pattern.permute.xlu1 %v3156_v33 }
  0x83   : > { %1656 = vperm.xlu1 %3028, %v3259_v15  }
  0x87   : > { %1660 = vperm.xlu1 %3028, %v3275_v19  }
  0x8b   : > { %3029 = vset.pattern.permute.xlu1 %v3157_v35 }
  0x8c   : > { %1817 = vperm.xlu1 %3029, %v3236_v8  }
  0x8d   : > { %v3418_v57 = vpop.permute.xlu1 %657 }
  0x8e   : > { %v3416_v56 = vpop.permute.xlu0 %649 }
  0x90   : > { %1825 = vperm.xlu1 %3029, %v3234_v7  }
  0x91   : > { %v3431_v61 = vpop.permute.xlu1 %661 }
  0x92   : > { %v3429_v60 = vpop.permute.xlu0 %653 }
  0x94   : > { %1829 = vperm.xlu1 %3029, %v3246_v11  }
  0x95   : > { %v3442_v0 = vpop.permute.xlu1 %669 }
  0x96   : > { %v3440_v63 = vpop.permute.xlu0 %665 }
  0x98   : > { %3031 = vset.pattern.permute.xlu1 %v3158_v41 }
  0x99   : > { %2002 = vperm.xlu1 %3031, %v3248_v12   ;;  %v3449_v2 = vpop.permute.xlu1 %677 }
  0x9a   : > { %v3447_v1 = vpop.permute.xlu0 %673 }
  0x9d   : > { %2006 = vperm.xlu1 %3031, %v3234_v7  }
  0x9e   : > { %v3454_v4 = vpop.permute.xlu1 %587 }
  0x9f   : > { %v3452_v3 = vpop.permute.xlu0 %582 }
  0xa1   : > { %3032 = vset.pattern.permute.xlu1 %v3157_v35 }
  0xa2   : > { %1833 = vperm.xlu1 %3032, %v3268_v16   ;;  %v3458_v5 = vpop.permute.xlu1 %592 }
  0xa3   : > { %v3460_v6 = vpop.permute.xlu0 %597 }
  0xa6   : > { %1841 = vperm.xlu1 %3032, %v3275_v19  }
  0xa7   : > { %v3463_v8 = vpop.permute.xlu1 %952 }
  0xa8   : > { %v3466_v9 = vpop.permute.xlu0 %956 }
  0xaa   : > { %1845 = vperm.xlu1 %3032, %v3273_v18  }
  0xab   : > { %v3468_v7 = vpop.permute.xlu1 %960 }
  0xad   : > { %v3474_v11 = vpop.permute.xlu0 %602 }
  0xae   : > { %3034 = vset.pattern.permute.xlu1 %v3158_v41 }
  0xaf   : > { %2018 = vperm.xlu1 %3034, %v3259_v15   ;;  %v3472_v10 = vpop.permute.xlu1 %964 }
  0xb1   : > { %v3479_v13 = vpop.permute.xlu0 %617 }
  0xb3   : > { %2022 = vperm.xlu1 %3034, %v3275_v19  }
  0xb4   : > { %v3477_v12 = vpop.permute.xlu1 %607 }
  0xb6   : > { %v3483_v16 = vpop.permute.xlu0 %972 }
  0xb8   : > { %v3481_v14 = vpop.permute.xlu1 %612 }
  0xbb   : > { %v3489_v20 = vpop.permute.xlu0 %1133 }
  0xbd   : > { %v3485_v17 = vpop.permute.xlu1 %968 }
  0xbe   : > { %4163 = vst [vmem:[#allocation3_spill] sm:$0xff] %v3485_v17 }
  0xbf   : > { %v3493_v21 = vpop.permute.xlu0 %1145 }
  0xc1   : > { %v3487_v18 = vpop.permute.xlu1 %976 }
  0xc2   : > { %4164 = vst [vmem:[#allocation4_spill] sm:$0xff] %v3487_v18 }
  0xc3   : > { %v3497_v19 = vpop.permute.xlu0 %1153 }
  0xc4   : > { %4166 = vst [vmem:[#allocation6_spill] sm:$0xff] %v3497_v19 }
  0xc5   : > { %v3491_v15 = vpop.permute.xlu1 %980  ;;  %v4196_v36 = vld [vmem:[#allocation3_spill] sm:$0xff] }
  0xc6   : > { %4165 = vst [vmem:[#allocation5_spill] sm:$0xff] %v3491_v15 }
  0xc7   : > { %v3503_v25 = vpop.permute.xlu0 %1161 }
  0xc8   : > { %4169 = vst [vmem:[#allocation9_spill] sm:$0xff] %v3503_v25 }
  0xca   : > { %v3495_v22 = vpop.permute.xlu1 %1137 }
  0xcc   : > { %v3507_v27 = vpop.permute.xlu0 %1459 }
  0xcd   : > { %4171 = vst [vmem:[#allocation11_spill] sm:$0xff] %v3507_v27 }
  0xce   : > { %v3499_v23 = vpop.permute.xlu1 %1141 }
  0xcf   : > { %4167 = vst [vmem:[#allocation7_spill] sm:$0xff] %v3499_v23 }
  0xd0   : > { %v3513_v30 = vpop.permute.xlu0 %1475 }
  0xd1   : > { %4174 = vst [vmem:[#allocation14_spill] sm:$0xff] %v3513_v30 }
  0xd2   : > { %v3501_v24 = vpop.permute.xlu1 %1149 }
  0xd3   : > { %4168 = vst [vmem:[#allocation8_spill] sm:$0xff] %v3501_v24 }
  0xd5   : > { %v3517_v32 = vpop.permute.xlu0 %1636 }
  0xd6   : > { %v3505_v26 = vpop.permute.xlu1 %1157 }
  0xd7   : > { %4170 = vst [vmem:[#allocation10_spill] sm:$0xff] %v3505_v26 }
  0xd9   : > { %v3521_v34 = vpop.permute.xlu0 %1648 }
  0xdb   : > { %v3509_v28 = vpop.permute.xlu1 %1455 }
  0xdc   : > { %4172 = vst [vmem:[#allocation12_spill] sm:$0xff] %v3509_v28 }
  0xdd   : > { %v3530_v44 = vpop.permute.xlu0 %1652 }
  0xdf   : > { %v3511_v29 = vpop.permute.xlu1 %1463 }
  0xe0   : > { %4173 = vst [vmem:[#allocation13_spill] sm:$0xff] %v3511_v29 }
  0xe1   : > { %v3539_v52 = vpop.permute.xlu0 %1664 }
  0xe3   : > { %v3515_v31 = vpop.permute.xlu1 %1467 }
  0xe4   : > { %4175 = vst [vmem:[#allocation15_spill] sm:$0xff] %v3515_v31 }
  0xe8   : > { %v3519_v33 = vpop.permute.xlu1 %1640 }
  0xec   : > { %v3523_v35 = vpop.permute.xlu1 %1644 }
  0xed   : > { %v514_v37 = vpop.f32.mrf.mxu0 }
  0xef   : > { %v516_v40 = vpop.f32.mrf.mxu0 }
  0xf0   : > { %v3526_v41 = vadd.f32 %v516_v40, %v3356_v39  ;;  %v515_v40 = vadd.f32 %v514_v37, %v369_v50 }
  0xf1   : > { %v518_v42 = vpop.f32.mrf.mxu0  ;;  %v3528_v43 = vpop.permute.xlu1 %1471 }
  0xf2   : > { %4176 = vst [vmem:[#allocation16_spill] sm:$0xff] %v3526_v41  ;;  %4177 = vst [vmem:[#allocation17_spill] sm:$0xff] %v3528_v43  ;;  %v519_v53 = vadd.f32 %v518_v42, %v369_v50 }
  0xf3   : > { %v520_v46 = vpop.f32.mrf.mxu0 }
  0xf4   : > { %v3534_v47 = vadd.f32 %v520_v46, %v3356_v39 }
  0xf5   : > { %v524_v48 = vpop.f32.mrf.mxu0  ;;  %v3536_v49 = vpop.permute.xlu1 %1479 }
  0xf6   : > { %4178 = vst [vmem:[#allocation18_spill] sm:$0xff] %v3534_v47  ;;  %4179 = vst [vmem:[#allocation19_spill] sm:$0xff] %v3536_v49  ;;  %v525_v41 = vadd.f32 %v524_v48, %v369_v50  ;;  %v3546_v47 = vmax.f32 %v519_v53, 0.0  ;;  %v3553_v49 = vmax.f32 %v515_v40, 0.0 }
  0xf7   : > { %v526_v51 = vpop.f32.mrf.mxu0 }
  0xf8   : > { %v3542_v54 = vadd.f32 %v526_v51, %v3356_v39  ;;  %4182 = vst [vmem:[#allocation22_spill] sm:$0xff] %v3546_v47  ;;  %v3555_v42 = vmax.f32 %v525_v41, 0.0  ;;  %v935_v37 = vrot.slane %v3546_v47, 1  ;;  %v4157_v41 = vrot.slane %v3553_v49, 1 }
  0xf9   : > { %v528_v55 = vpop.f32.mrf.mxu0  ;;  %v3544_v58 = vpop.permute.xlu1 %1483  ;;  %v561_v26 = vrot.slane %v3553_v49, 7  ;;  %v681_v25 = vmul.f32 %v3429_v60, %v3553_v49 }
  0xfa   : > { %4180 = vst [vmem:[#allocation20_spill] sm:$0xff] %v3542_v54  ;;  %4181 = vst [vmem:[#allocation21_spill] sm:$0xff] %v3544_v58  ;;  %v529_v43 = vadd.f32 %v528_v55, %v369_v50  ;;  %v1822_v54 = vpop.permute.xlu0 %1821  ;;  %v563_v40 = vrot.slane %v3555_v42, 7  ;;  %v936_v28 = vrot.slane %v3555_v42, 1 }
  0xfb   : > { %v530_v46 = vpop.f32.mrf.mxu0  ;;  %4184 = vst [vmem:[#allocation24_spill] sm:$0xff] %v3555_v42  ;;  %v3609_v24 = vmul.f32 %v1822_v54, %v3555_v42 }
  0xfc   : > { %v3548_v29 = vmax.f32 %v529_v43, 0.0  ;;  %v3551_v38 = vadd.f32 %v530_v46, %v3356_v39 }
  0xfd   : > { %v534_v45 = vpop.f32.mrf.mxu0 }
  0xfe   : > { %4183 = vst [vmem:[#allocation23_spill] sm:$0xff] %v3551_v38  ;;  %v3557_v51 = vpop.permute.xlu1 %1656  ;;  %v535_v48 = vadd.f32 %v534_v45, %v369_v50  ;;  %v562_v38 = vrot.slane %v3546_v47, 7  ;;  %v937_v19 = vrot.slane %v3548_v29, 1 }
  0xff   : > { %v536_v58 = vpop.f32.mrf.mxu0 }
 0x100   : > { %v3561_v53 = vadd.f32 %v536_v58, %v3356_v39  ;;  %v3575_v58 = vsel %vm942_vm0, %v4157_v41, %v935_v37  ;;  %v3577_v45 = vmax.f32 %v535_v48, 0.0  ;;  %v682_v48 = vmul.f32 %v3418_v57, %v3546_v47 }
 0x101   : > { %v538_v55 = vpop.f32.mrf.mxu0  ;;  %v3597_v41 = vmul.f32 %v3466_v9, %v3575_v58  ;;  %v3603_v60 = vsel %vm571_vm1, %v561_v26, %v562_v38 }
 0x102   : > { %4185 = vst [vmem:[#allocation25_spill] sm:$0xff] %v3561_v53  ;;  %v3568_v46 = vpop.permute.xlu1 %1660  ;;  %v3583_v53 = vpop.permute.xlu0 %1837  ;;  %v622_v9 = vmul.f32 %v3458_v5, %v3603_v60  ;;  %v684_v5 = vmul.f32 %v3440_v63, %v3548_v29 }
 0x103   : > { %v540_v30 = vpop.f32.mrf.mxu0 }
 0x104   : > { %v3580_v43 = vadd.f32 %v540_v30, %v3356_v39  ;;  %v3593_v30 = vsel %vm571_vm1, %v562_v38, %v563_v40 }
 0x105   : > { %v544_v31 = vpop.f32.mrf.mxu0  ;;  %v3622_v38 = vmul.f32 %v3460_v6, %v3593_v30  ;;  %v3635_v6 = vmul.f32 %v3517_v32, %v3603_v60  ;;  %v3656_v32 = vsel %vm942_vm0, %v936_v28, %v937_v19 }
 0x106   : > { %4186 = vst [vmem:[#allocation26_spill] sm:$0xff] %v3580_v43  ;;  %v545_v27 = vadd.f32 %v544_v31, %v369_v50  ;;  %v539_v43 = vadd.f32 %v538_v55, %v369_v50  ;;  %v683_v31 = vmul.f32 %v3431_v61, %v3555_v42  ;;  %v3618_v61 = vsel %vm942_vm0, %v935_v37, %v936_v28 }
 0x107   : > { %v1818_v18 = vpop.permute.xlu1 %1817  ;;  %v546_v15 = vpop.f32.mrf.mxu0 }
 0x108   : > { %v3606_v57 = vmul.f32 %v1818_v18, %v3546_v47  ;;  %v3612_v23 = vadd.f32 %v546_v15, %v3356_v39  ;;  %v564_v18 = vrot.slane %v3548_v29, 7  ;;  %v3625_v54 = vmax.f32 %v545_v27, 0.0  ;;  %v1999_v39 = vpop.permute.xlu0 %1998 }
 0x109   : > { %v548_v55 = vpop.f32.mrf.mxu0  ;;  %v3631_v42 = vmax.f32 %v539_v43, 0.0  ;;  %v689_v47 = vpack.c.bf16 %v683_v31, %v682_v48  ;;  %v3639_v27 = vmul.f32 %v3519_v33, %v3593_v30  ;;  %v4189_v43 = vrot.slane %v3577_v45, 7 }
 0x10a   : > { %4187 = vst [vmem:[#allocation27_spill] sm:$0xff] %v3606_v57  ;;  %4188 = vst [vmem:[#allocation28_spill] sm:$0xff] %v3612_v23  ;;  %v549_v23 = vadd.f32 %v548_v55, %v369_v50  ;;  %v3644_v50 = vmul.f32 %v1999_v39, %v3618_v61  ;;  %v629_v33 = vpack.c.bf16 %v3622_v38, %v622_v9  ;;  %v567_v31 = vrot.slane %v3625_v54, 7 }
 0x10b   : > { %v1826_v37 = vpop.permute.xlu1 %1825  ;;  %v3652_v48 = vsel %vm571_vm1, %v564_v18, %v4189_v43  ;;  %v3663_v39 = vsel %vm571_vm1, %v563_v40, %v564_v18  ;;  %v938_v43 = vrot.slane %v3577_v45, 1  ;;  %v3081_v40 = vld [vmem:[%s4151_s3 + $0xb0] sm:$0xff]  }
 0x10c   : > { %v3641_v17 = vmax.f32 %v549_v23, 0.0  ;;  %v685_v23 = vmul.f32 %v3442_v0, %v3577_v45  ;;  %v3671_v28 = vmul.f32 %v1826_v37, %v3548_v29  ;;  %v625_v0 = vmul.f32 %v3477_v12, %v3652_v48 }
 0x10e   : > { %v680_v63 = vmul.f32 %v3416_v56, %v3641_v17  ;;  %v568_v55 = vrot.slane %v3641_v17, 7  ;;  %v690_v9 = vpack.c.bf16 %v685_v23, %v684_v5  ;;  %v4191_v5 = vrot.slane %v3553_v49, 1 }
 0x10f   : > { %v1830_v15 = vpop.permute.xlu1 %1829 }
 0x110   : > { %v3678_v38 = vmul.f32 %v1830_v15, %v3577_v45  ;;  %v688_v56 = vpack.c.bf16 %v681_v25, %v680_v63  ;;  %v3682_v18 = vsel %vm571_vm1, %v567_v31, %v568_v55  ;;  %v579_v37 = vsel %vm571_vm1, %v568_v55, %v561_v26 }
 0x111   : > { %v620_v57 = vmul.f32 %v3452_v3, %v3682_v18  ;;  %v621_v12 = vmul.f32 %v3454_v4, %v579_v37  ;;  %v624_v15 = vmul.f32 %v3474_v11, %v3663_v39  ;;  %v566_v25 = vrot.slane %v3631_v42, 7 }
 0x112   : > { %v1857_v63 = vpack.c.bf16 %v3678_v38, %v3671_v28  ;;  %2755 = vmatprep.mubr.bf16.mxu1 %v688_v56  ;;  %v3699_v26 = vmul.f32 %v3523_v35, %v3663_v39  ;;  %v3703_v3 = vmul.f32 %v3521_v34, %v3652_v48  ;;  %v4190_v55 = vrot.slane %v3631_v42, 1  ;;  %v3131_v28 = vld [vmem:[%s4151_s3 + $0x218] sm:$0xff]  }
 0x113   : > { %2756 = vmatmul.mubr.bf16.vlgmr.msra.gmra.mxu1 %v689_v47  ;;  %v628_v4 = vpack.c.bf16 %v621_v12, %v620_v57  ;;  %v687_v56 = vmul.f32 %v3449_v2, %v3625_v54  ;;  %v4192_v35 = vrot.slane %v3641_v17, 1  ;;  %v630_v47 = vpack.c.bf16 %v625_v0, %v624_v15  ;;  %v3082_v2 = vld [vmem:[%s4151_s3 + $0xf0] sm:$0xff]  }
 0x114   : > { %v3709_v11 = vsel %vm942_vm0, %v938_v43, %v4190_v55  ;;  %2788 = vmatpush3.bf16.msra.mxu1 %v3427_v59  ;;  %v2003_v34 = vpop.permute.xlu1 %2002  ;;  %2759 = vmatprep.mubr.bf16.mxu1 %v690_v9  ;;  %v3724_v57 = vsel %vm942_vm0, %v937_v19, %v938_v43  ;;  %v686_v12 = vmul.f32 %v3447_v1, %v3631_v42  ;;  %v2011_v55 = vpop.permute.xlu0 %2010  ;;  %v3083_v59 = vld [vmem:[%s4151_s3 + $0xa8] sm:$0xff]   ;;  %v4193_v43 = vrot.slane %v3577_v45, 7 }
 0x115   : > { %v3719_v23 = vsel %vm942_vm0, %v4192_v35, %v4191_v5  ;;  %v3732_v5 = vmul.f32 %v2003_v34, %v3656_v32  ;;  %2779 = vmatprep.mubr.bf16.mxu0 %v628_v4  ;;  %2789 = vmatprep.subr.bf16.mxu1 %v3081_v40  ;;  %v3739_v19 = vsel %vm571_vm1, %v566_v25, %v567_v31 }
 0x116   : > { %v3745_v0 = vsel %vm571_vm1, %v4193_v43, %v566_v25  ;;  %2780 = vmatmul.mubr.bf16.vlgmr.msra.gmra.mxu0 %v629_v33  ;;  %v3748_v1 = vmul.f32 %v2011_v55, %v3709_v11  ;;  %v983_v9 = vmul.f32 %v3463_v8, %v3719_v23  ;;  %v1316_v15 = vpack.c.bf16 %v3641_v17, %v3625_v54 }
 0x117   : > { %v1675_v31 = vpack.c.bf16 %v3639_v27, %v3635_v6  ;;  %2812 = vmatpush3.bf16.msra.mxu0 %v3438_v62  ;;  %2783 = vmatprep.mubr.bf16.mxu0 %v630_v47  ;;  %v691_v25 = vpack.c.bf16 %v687_v56, %v686_v12  ;;  %v1676_v33 = vpack.c.bf16 %v3703_v3, %v3699_v26  ;;  %v3120_v6 = vld [vmem:[%s4151_s3 + $0x1d8] sm:$0xff]   ;;  %v3121_v27 = vld [vmem:[%s4151_s3 + $0x190] sm:$0xff]   ;;  %v3130_v26 = vld [vmem:[%s4151_s3 + $0x220] sm:$0xff]  }
 0x118   : > { %2790 = vmatpush3.bf16.msra.mxu1 %v3081_v40  ;;  %v2007_v35 = vpop.permute.xlu1 %2006  ;;  %2813 = vmatprep.subr.bf16.mxu0 %v3082_v2  ;;  %v627_v8 = vmul.f32 %v3479_v13, %v3739_v19  ;;  %v3765_v34 = vmul.f32 %v3530_v44, %v3745_v0  ;;  %v3769_v55 = vmul.f32 %v3557_v51, %v3739_v19  ;;  %v3084_v40 = vld [vmem:[%s4151_s3 + $0xe8] sm:$0xff]   ;;  %v3085_v13 = vld [vmem:[%s4151_s3 + $0xa0] sm:$0xff]  }
 0x119   : > { %v3772_v62 = vmul.f32 %v2007_v35, %v3724_v57  ;;  %2791 = vmatprep.subr.bf16.mxu1 %v3083_v59  ;;  %v1164_v56 = vmul.f32 %v3489_v20, %v579_v37  ;;  %v3783_v44 = vmul.f32 %v3568_v46, %v3682_v18  ;;  %v3786_v51 = vmul.f32 %v3539_v52, %v579_v37 }
 0x11a   : > { %v991_v47 = vpack.c.bf16 %v3597_v41, %v983_v9  ;;  %v626_v12 = vmul.f32 %v3481_v14, %v3745_v0  ;;  %v1677_v43 = vpack.c.bf16 %v3769_v55, %v3765_v34  ;;  %v1165_v20 = vmul.f32 %v3495_v22, %v3603_v60  ;;  %v3086_v14 = vld [vmem:[%s4151_s3 + $0xe0] sm:$0xff]   ;;  %v3088_v9 = vld [vmem:[%s4151_s3 + $0xd8] sm:$0xff]  }
 0x11b   : > { %2814 = vmatpush3.bf16.msra.mxu0 %v3082_v2  ;;  %2760 = vmatmul.mubr.bf16.gmra.mxu1 %v691_v25  ;;  %v3087_v2 = vld [vmem:[%s4151_s3 + $0x98] sm:$0xff]   ;;  %v3810_v60 = vmul.f32 %v3583_v53, %v3625_v54  ;;  %v3090_v53 = vld [vmem:[%s4151_s3 + $0xd0] sm:$0xff]   ;;  %v986_v4 = vmul.f32 %v3472_v10, %v3656_v32  ;;  %v987_v52 = vmul.f32 %v4196_v36, %v3724_v57 }
 0x11c   : > { %2792 = vmatpush3.bf16.msra.mxu1 %v3083_v59  ;;  %2803 = vmatprep.mubr.bf16.mxu1 %v991_v47  ;;  %v631_v41 = vpack.c.bf16 %v627_v8, %v626_v12  ;;  %v1172_v37 = vpack.c.bf16 %v1165_v20, %v1164_v56  ;;  %v3089_v8 = vld [vmem:[%s4151_s3 + $0x90] sm:$0xff]   ;;  %v3091_v56 = vld [vmem:[%s4151_s3 + $0x88] sm:$0xff]   ;;  %v2015_v47 = vpop.permute.xlu0 %2014  ;;  %v4218_v3 = vpack.c.bf16 %v3786_v51, %v3783_v44  ;;  %v3135_v51 = vld [vmem:[%s4152_s4 + $0x38] sm:$0xff]  }
 0x11d   : > { %v1834_v46 = vpop.permute.xlu1 %1833  ;;  %2815 = vmatprep.subr.bf16.mxu0 %v3084_v40  ;;  %2793 = vmatprep.subr.bf16.mxu1 %v3085_v13  ;;  %v4221_v34 = vpack.c.bf16 %v3748_v1, %v3772_v62  ;;  %v3137_v1 = vld [vmem:[%s4152_s4 + $0x28] sm:$0xff]   ;;  %v3138_v62 = vld [vmem:[%s4152_s4 + $0x20] sm:$0xff]  }
 0x11e   : > { %v3806_v22 = vmul.f32 %v1834_v46, %v3631_v42  ;;  %2784 = vmatmul.mubr.bf16.gmra.mxu0 %v631_v41  ;;  %v3094_v41 = vld [vmem:[%s4151_s3 + $0xc0] sm:$0xff]  }
 0x11f   : > { %2816 = vmatpush3.bf16.msra.mxu0 %v3084_v40  ;;  %2827 = vmatprep.mubr.bf16.mxu0 %v1172_v37  ;;  %v940_v40 = vrot.slane %v3625_v54, 1  ;;  %v3092_v37 = vld [vmem:[%s4151_s3 + $0xc8] sm:$0xff]  }
 0x120   : > { %2794 = vmatpush3.bf16.msra.mxu1 %v3085_v13  ;;  %2817 = vmatprep.subr.bf16.mxu0 %v3086_v14  ;;  %v2027_v35 = vpop.permute.xlu0 %2026 }
 0x121   : > { %v1842_v25 = vpop.permute.xlu1 %1841  ;;  %2795 = vmatprep.subr.bf16.mxu1 %v3087_v2 }
 0x122   : > { %v3828_v12 = vmul.f32 %v1842_v25, %v3641_v17  ;;  %v4195_v25 = vrot.slane %v3641_v17, 1  ;;  %v4215_v17 = vld [vmem:[#allocation27_spill] sm:$0xff] }
 0x123   : > { %2818 = vmatpush3.bf16.msra.mxu0 %v3086_v14  ;;  %v4194_v14 = vrot.slane %v3631_v42, 1  ;;  %v4216_v54 = vpack.c.bf16 %v3609_v24, %v4215_v17  ;;  %v3123_v24 = vld [vmem:[%s4151_s3 + $0x188] sm:$0xff]  }
 0x124   : > { %2796 = vmatpush3.bf16.msra.mxu1 %v3087_v2  ;;  %2819 = vmatprep.subr.bf16.mxu0 %v3088_v9  ;;  %v3093_v2 = vld [vmem:[%s4151_s3 + $0x80] sm:$0xff]  }
 0x125   : > { %v1846_v13 = vpop.permute.xlu1 %1845  ;;  %2797 = vmatprep.subr.bf16.mxu1 %v3089_v8  ;;  %v3839_v46 = vsel %vm942_vm0, %v4194_v14, %v940_v40 }
 0x126   : > { %v3831_v20 = vmul.f32 %v1846_v13, %v3553_v49  ;;  %v3854_v13 = vmul.f32 %v2015_v47, %v3839_v46 }
 0x127   : > { %2820 = vmatpush3.bf16.msra.mxu0 %v3088_v9 }
 0x128   : > { %2798 = vmatpush3.bf16.msra.mxu1 %v3089_v8  ;;  %2821 = vmatprep.subr.bf16.mxu0 %v3090_v53  ;;  %v3851_v8 = vsel %vm942_vm0, %v940_v40, %v4195_v25  ;;  %v3095_v40 = vld [vmem:[%s4151_s3 + $0x138] sm:$0xff]   ;;  %v1167_v25 = vmul.f32 %v3493_v21, %v3663_v39  ;;  %v3097_v21 = vld [vmem:[%s4151_s3 + $0x130] sm:$0xff]   ;;  %v4220_v38 = vpack.c.bf16 %v3831_v20, %v3828_v12 }
 0x129   : > { %2799 = vmatprep.subr.bf16.mxu1 %v3091_v56  ;;  %v3140_v12 = vld [vmem:[%s4152_s4 + $0x10] sm:$0xff]  }
 0x12a   : > { %v2019_v9 = vpop.permute.xlu1 %2018 }
 0x12b   : > { %v3857_v14 = vmul.f32 %v2019_v9, %v3851_v8  ;;  %2822 = vmatpush3.bf16.msra.mxu0 %v3090_v53  ;;  %v988_v53 = vmul.f32 %v3483_v16, %v3709_v11  ;;  %v985_v9 = vmul.f32 %v3468_v7, %v3618_v61  ;;  %v3096_v7 = vld [vmem:[%s4151_s3 + $0x178] sm:$0xff]  }
 0x12c   : > { %2800 = vmatpush3.bf16.msra.mxu1 %v3091_v56  ;;  %2823 = vmatprep.subr.bf16.mxu0 %v3092_v37  ;;  %v3872_v56 = vmul.f32 %v2027_v35, %v3575_v58  ;;  %v4197_v35 = vld [vmem:[#allocation6_spill] sm:$0xff] }
 0x12d   : > { %2801 = vmatprep.subr.bf16.mxu1 %v3093_v2  ;;  %v992_v59 = vpack.c.bf16 %v986_v4, %v985_v9  ;;  %v993_v39 = vpack.c.bf16 %v988_v53, %v987_v52  ;;  %v4199_v4 = vld [vmem:[#allocation8_spill] sm:$0xff]  ;;  %v4222_v55 = vpack.c.bf16 %v3857_v14, %v3854_v13  ;;  %v3141_v13 = vld [vmem:[%s4152_s4 + $0x8] sm:$0xff]  }
 0x12e   : > { %v2023_v47 = vpop.permute.xlu1 %2022 }
 0x12f   : > { %v3877_v10 = vmul.f32 %v2023_v47, %v3719_v23  ;;  %2824 = vmatpush3.bf16.msra.mxu0 %v3092_v37  ;;  %v1169_v37 = vmul.f32 %v4197_v35, %v3745_v0  ;;  %v1168_v47 = vmul.f32 %v4199_v4, %v3652_v48  ;;  %v3098_v0 = vld [vmem:[%s4151_s3 + $0x170] sm:$0xff]   ;;  %v4200_v35 = vld [vmem:[#allocation5_spill] sm:$0xff] }
 0x130   : > { %2802 = vmatpush3.bf16.msra.mxu1 %v3093_v2  ;;  %2825 = vmatprep.subr.bf16.mxu0 %v3094_v41  ;;  %v4198_v2 = vld [vmem:[#allocation7_spill] sm:$0xff]  ;;  %v990_v16 = vmul.f32 %v4200_v35, %v3851_v8  ;;  %v4201_v48 = vld [vmem:[#allocation4_spill] sm:$0xff] }
 0x131   : > { %2835 = vmatprep.subr.bf16.mxu1 %v3095_v40  ;;  %v1166_v36 = vmul.f32 %v4198_v2, %v3593_v30  ;;  %v1174_v52 = vpack.c.bf16 %v1169_v37, %v1168_v47  ;;  %v3099_v30 = vld [vmem:[%s4151_s3 + $0x128] sm:$0xff]   ;;  %v3101_v37 = vld [vmem:[%s4151_s3 + $0x120] sm:$0xff]   ;;  %v4223_v44 = vpack.c.bf16 %v3872_v56, %v3877_v10  ;;  %v4103_v56 = vpop.f32.mrf.mxu0 }
 0x132   : > { %v4204_v2 = vld [vmem:[#allocation22_spill] sm:$0xff]  ;;  %v3107_v35 = vld [vmem:[%s4151_s3 + $0x108] sm:$0xff]   ;;  %4224 = vst [vmem:[#allocation3_spill] sm:$0xff] %v4103_v56 }
 0x133   : > { %2804 = vmatmul.mubr.bf16.vlgmr.msra.gmra.mxu1 %v992_v59  ;;  %2826 = vmatpush3.bf16.msra.mxu0 %v3094_v41  ;;  %v1173_v9 = vpack.c.bf16 %v1167_v25, %v1166_v36  ;;  %v989_v59 = vmul.f32 %v4201_v48, %v3839_v46  ;;  %v4202_v41 = vld [vmem:[#allocation9_spill] sm:$0xff]  ;;  %v3100_v25 = vld [vmem:[%s4151_s3 + $0x168] sm:$0xff]   ;;  %v4205_v36 = vld [vmem:[#allocation10_spill] sm:$0xff] }
 0x134   : > { %2807 = vmatprep.mubr.bf16.mxu1 %v993_v39  ;;  %2836 = vmatpush3.bf16.msra.mxu1 %v3095_v40  ;;  %v1171_v40 = vmul.f32 %v4202_v41, %v3682_v18  ;;  %v1170_v4 = vmul.f32 %v4205_v36, %v3739_v19  ;;  %v4206_v18 = vld [vmem:[#allocation12_spill] sm:$0xff]  ;;  %v3110_v48 = vld [vmem:[%s4151_s3 + $0x140] sm:$0xff]   ;;  %v4207_v41 = vld [vmem:[#allocation15_spill] sm:$0xff] }
 0x135   : > { %2859 = vmatprep.subr.bf16.mxu0 %v3096_v7  ;;  %2837 = vmatprep.subr.bf16.mxu1 %v3097_v21  ;;  %v994_v53 = vpack.c.bf16 %v990_v16, %v989_v59  ;;  %v1486_v16 = vmul.f32 %v4206_v18, %v3575_v58  ;;  %v3104_v58 = vld [vmem:[%s4151_s3 + $0x158] sm:$0xff]   ;;  %v3105_v19 = vld [vmem:[%s4151_s3 + $0x110] sm:$0xff]   ;;  %v3142_v10 = vld [vmem:[%s4152_s4] sm:$0xff]  }
 0x136   : > { %2828 = vmatmul.mubr.bf16.vlgmr.msra.gmra.mxu0 %v1173_v9  ;;  %v1175_v47 = vpack.c.bf16 %v1171_v40, %v1170_v4  ;;  %v3102_v9 = vld [vmem:[%s4151_s3 + $0x160] sm:$0xff]   ;;  %v3111_v59 = vld [vmem:[%s4151_s3 + $0x1b8] sm:$0xff]   ;;  %v1489_v40 = vmul.f32 %v4207_v41, %v3724_v57  ;;  %v1315_v57 = vpack.c.bf16 %v3631_v42, %v3577_v45  ;;  %v3115_v42 = vld [vmem:[%s4151_s3 + $0x1a8] sm:$0xff]  }
 0x137   : > { %2831 = vmatprep.mubr.bf16.mxu0 %v1174_v52  ;;  %2860 = vmatpush3.bf16.msra.mxu0 %v3096_v7  ;;  %v4203_v7 = vld [vmem:[#allocation11_spill] sm:$0xff]  ;;  %v4212_v4 = vld [vmem:[#allocation17_spill] sm:$0xff] }
 0x138   : > { %2838 = vmatpush3.bf16.msra.mxu1 %v3097_v21  ;;  %2861 = vmatprep.subr.bf16.mxu0 %v3098_v0  ;;  %v1487_v39 = vmul.f32 %v4203_v7, %v3618_v61  ;;  %v1313_v21 = vpack.c.bf16 %v4204_v2, %v3553_v49  ;;  %v3103_v49 = vld [vmem:[%s4151_s3 + $0x118] sm:$0xff]   ;;  %v3108_v52 = vld [vmem:[%s4151_s3 + $0x148] sm:$0xff]   ;;  %v3113_v7 = vld [vmem:[%s4151_s3 + $0x1b0] sm:$0xff]   ;;  %v1490_v18 = vmul.f32 %v4212_v4, %v3709_v11 }
 0x139   : > { %2839 = vmatprep.subr.bf16.mxu1 %v3099_v30  ;;  %v4214_v11 = vld [vmem:[#allocation21_spill] sm:$0xff] }
 0x13a   : > { %v1494_v61 = vpack.c.bf16 %v1487_v39, %v1486_v16  ;;  %v4209_v39 = vld [vmem:[#allocation13_spill] sm:$0xff] }
 0x13b   : > { %2808 = vmatmul.mubr.bf16.gmra.mxu1 %v994_v53  ;;  %2862 = vmatpush3.bf16.msra.mxu0 %v3098_v0  ;;  %v3106_v0 = vld [vmem:[%s4151_s3 + $0x150] sm:$0xff]   ;;  %v3112_v53 = vld [vmem:[%s4151_s3 + $0x1f8] sm:$0xff]   ;;  %v1488_v2 = vmul.f32 %v4209_v39, %v3656_v32 }
 0x13c   : > { %2840 = vmatpush3.bf16.msra.mxu1 %v3099_v30  ;;  %2851 = vmatprep.mubr.bf16.mxu1 %v1313_v21  ;;  %v3109_v30 = vld [vmem:[%s4151_s3 + $0x100] sm:$0xff]   ;;  %v4210_v21 = vld [vmem:[#allocation24_spill] sm:$0xff] }
 0x13d   : > { %2863 = vmatprep.subr.bf16.mxu0 %v3100_v25  ;;  %2841 = vmatprep.subr.bf16.mxu1 %v3101_v37  ;;  %v4211_v36 = vpack.c.bf16 %v3548_v29, %v4210_v21  ;;  %v1495_v16 = vpack.c.bf16 %v1489_v40, %v1488_v2  ;;  %v4213_v29 = vld [vmem:[#allocation19_spill] sm:$0xff] }
 0x13e   : > { %2832 = vmatmul.mubr.bf16.gmra.mxu0 %v1175_v47  ;;  %v1492_v45 = vmul.f32 %v4213_v29, %v3851_v8  ;;  %v1493_v47 = vmul.f32 %v4214_v11, %v3719_v23  ;;  %v3118_v8 = vld [vmem:[%s4151_s3 + $0x1e0] sm:$0xff]  }
 0x13f   : > { %2864 = vmatpush3.bf16.msra.mxu0 %v3100_v25  ;;  %2875 = vmatprep.mubr.bf16.mxu0 %v1494_v61  ;;  %v4208_v25 = vld [vmem:[#allocation14_spill] sm:$0xff] }
 0x140   : > { %2842 = vmatpush3.bf16.msra.mxu1 %v3101_v37  ;;  %2865 = vmatprep.subr.bf16.mxu0 %v3102_v9  ;;  %v1491_v37 = vmul.f32 %v4208_v25, %v3839_v46  ;;  %v3114_v46 = vld [vmem:[%s4151_s3 + $0x1f0] sm:$0xff]   ;;  %v3117_v61 = vld [vmem:[%s4151_s3 + $0x1a0] sm:$0xff]   ;;  %v1497_v23 = vpack.c.bf16 %v1493_v47, %v1492_v45 }
 0x141   : > { %2843 = vmatprep.subr.bf16.mxu1 %v3103_v49 }
 0x142   : > { %v1496_v32 = vpack.c.bf16 %v1491_v37, %v1490_v18 }
 0x143   : > { %2866 = vmatpush3.bf16.msra.mxu0 %v3102_v9  ;;  %v3116_v9 = vld [vmem:[%s4151_s3 + $0x1e8] sm:$0xff]  }
 0x144   : > { %2844 = vmatpush3.bf16.msra.mxu1 %v3103_v49  ;;  %2867 = vmatprep.subr.bf16.mxu0 %v3104_v58  ;;  %v3119_v49 = vld [vmem:[%s4151_s3 + $0x198] sm:$0xff]  }
 0x145   : > { %2845 = vmatprep.subr.bf16.mxu1 %v3105_v19 }
 0x147   : > { %2868 = vmatpush3.bf16.msra.mxu0 %v3104_v58  ;;  %v3125_v58 = vld [vmem:[%s4151_s3 + $0x180] sm:$0xff]  }
 0x148   : > { %2846 = vmatpush3.bf16.msra.mxu1 %v3105_v19  ;;  %2869 = vmatprep.subr.bf16.mxu0 %v3106_v0  ;;  %v3126_v19 = vld [vmem:[%s4151_s3 + $0x1c0] sm:$0xff]  }
 0x149   : > { %2847 = vmatprep.subr.bf16.mxu1 %v3107_v35 }
 0x14b   : > { %2870 = vmatpush3.bf16.msra.mxu0 %v3106_v0  ;;  %v3127_v0 = vld [vmem:[%s4151_s3 + $0x238] sm:$0xff]  }
 0x14c   : > { %2848 = vmatpush3.bf16.msra.mxu1 %v3107_v35  ;;  %2871 = vmatprep.subr.bf16.mxu0 %v3108_v52  ;;  %v3128_v35 = vld [vmem:[%s4151_s3 + $0x230] sm:$0xff]  }
 0x14d   : > { %2849 = vmatprep.subr.bf16.mxu1 %v3109_v30 }
 0x14f   : > { %2872 = vmatpush3.bf16.msra.mxu0 %v3108_v52  ;;  %v3129_v52 = vld [vmem:[%s4151_s3 + $0x228] sm:$0xff]  }
 0x150   : > { %2850 = vmatpush3.bf16.msra.mxu1 %v3109_v30  ;;  %2873 = vmatprep.subr.bf16.mxu0 %v3110_v48  ;;  %v4217_v30 = vpack.c.bf16 %v3810_v60, %v3806_v22  ;;  %v3139_v22 = vld [vmem:[%s4152_s4 + $0x18] sm:$0xff]  }
 0x151   : > { %2883 = vmatprep.subr.bf16.mxu1 %v3111_v59 }
 0x153   : > { %2852 = vmatmul.mubr.bf16.vlgmr.msra.gmra.mxu1 %v4211_v36  ;;  %2874 = vmatpush3.bf16.msra.mxu0 %v3110_v48 }
 0x154   : > { %2855 = vmatprep.mubr.bf16.mxu1 %v1315_v57  ;;  %2884 = vmatpush3.bf16.msra.mxu1 %v3111_v59 }
 0x155   : > { %2907 = vmatprep.subr.bf16.mxu0 %v3112_v53  ;;  %2885 = vmatprep.subr.bf16.mxu1 %v3113_v7 }
 0x156   : > { %2876 = vmatmul.mubr.bf16.vlgmr.msra.gmra.mxu0 %v1495_v16 }
 0x157   : > { %2879 = vmatprep.mubr.bf16.mxu0 %v1496_v32  ;;  %2908 = vmatpush3.bf16.msra.mxu0 %v3112_v53 }
 0x158   : > { %2886 = vmatpush3.bf16.msra.mxu1 %v3113_v7  ;;  %2909 = vmatprep.subr.bf16.mxu0 %v3114_v46 }
 0x159   : > { %2887 = vmatprep.subr.bf16.mxu1 %v3115_v42 }
 0x15b   : > { %2856 = vmatmul.mubr.bf16.gmra.mxu1 %v1316_v15  ;;  %2910 = vmatpush3.bf16.msra.mxu0 %v3114_v46  ;;  %v3122_v15 = vld [vmem:[%s4151_s3 + $0x1d0] sm:$0xff]  }
 0x15c   : > { %2888 = vmatpush3.bf16.msra.mxu1 %v3115_v42  ;;  %2899 = vmatprep.mubr.bf16.mxu1 %v1675_v31  ;;  %v3124_v31 = vld [vmem:[%s4151_s3 + $0x1c8] sm:$0xff]  }
 0x15d   : > { %2911 = vmatprep.subr.bf16.mxu0 %v3116_v9  ;;  %2889 = vmatprep.subr.bf16.mxu1 %v3117_v61 }
 0x15e   : > { %2880 = vmatmul.mubr.bf16.gmra.mxu0 %v1497_v23 }
 0x15f   : > { %2912 = vmatpush3.bf16.msra.mxu0 %v3116_v9  ;;  %2923 = vmatprep.mubr.bf16.mxu0 %v4216_v54 }
 0x160   : > { %2890 = vmatpush3.bf16.msra.mxu1 %v3117_v61  ;;  %2913 = vmatprep.subr.bf16.mxu0 %v3118_v8 }
 0x161   : > { %2891 = vmatprep.subr.bf16.mxu1 %v3119_v49 }
 0x163   : > { %2914 = vmatpush3.bf16.msra.mxu0 %v3118_v8 }
 0x164   : > { %2892 = vmatpush3.bf16.msra.mxu1 %v3119_v49  ;;  %2915 = vmatprep.subr.bf16.mxu0 %v3120_v6 }
 0x165   : > { %2893 = vmatprep.subr.bf16.mxu1 %v3121_v27 }
 0x167   : > { %2916 = vmatpush3.bf16.msra.mxu0 %v3120_v6 }
 0x168   : > { %2894 = vmatpush3.bf16.msra.mxu1 %v3121_v27  ;;  %2917 = vmatprep.subr.bf16.mxu0 %v3122_v15 }
 0x169   : > { %2895 = vmatprep.subr.bf16.mxu1 %v3123_v24 }
 0x16b   : > { %2918 = vmatpush3.bf16.msra.mxu0 %v3122_v15 }
 0x16c   : > { %2896 = vmatpush3.bf16.msra.mxu1 %v3123_v24  ;;  %2919 = vmatprep.subr.bf16.mxu0 %v3124_v31 }
 0x16d   : > { %2897 = vmatprep.subr.bf16.mxu1 %v3125_v58 }
 0x16f   : > { %2920 = vmatpush3.bf16.msra.mxu0 %v3124_v31 }
 0x170   : > { %2898 = vmatpush3.bf16.msra.mxu1 %v3125_v58  ;;  %2921 = vmatprep.subr.bf16.mxu0 %v3126_v19 }
 0x171   : > { %2931 = vmatprep.subr.bf16.mxu1 %v3127_v0 }
 0x173   : > { %2900 = vmatmul.mubr.bf16.vlgmr.msra.gmra.mxu1 %v1676_v33  ;;  %2922 = vmatpush3.bf16.msra.mxu0 %v3126_v19  ;;  %v4219_v33 = vpack.c.bf16 %v3732_v5, %v3644_v50  ;;  %v3133_v50 = vld [vmem:[%s4151_s3 + $0x208] sm:$0xff]   ;;  %v3134_v5 = vld [vmem:[%s4151_s3 + $0x200] sm:$0xff]  }
 0x174   : > { %2903 = vmatprep.mubr.bf16.mxu1 %v1677_v43  ;;  %2932 = vmatpush3.bf16.msra.mxu1 %v3127_v0  ;;  %v3136_v43 = vld [vmem:[%s4152_s4 + $0x30] sm:$0xff]  }
 0x175   : > { %2933 = vmatprep.subr.bf16.mxu1 %v3128_v35  ;;  %2955 = vmatprep.subr.bf16.mxu0 %v3135_v51 }
 0x176   : > { %2924 = vmatmul.mubr.bf16.vlgmr.msra.gmra.mxu0 %v1857_v63  ;;  %v3132_v63 = vld [vmem:[%s4151_s3 + $0x210] sm:$0xff]  }
 0x177   : > { %2927 = vmatprep.mubr.bf16.mxu0 %v4217_v30  ;;  %2956 = vmatpush3.bf16.msra.mxu0 %v3135_v51 }
 0x178   : > { %2934 = vmatpush3.bf16.msra.mxu1 %v3128_v35  ;;  %2957 = vmatprep.subr.bf16.mxu0 %v3136_v43 }
 0x179   : > { %2935 = vmatprep.subr.bf16.mxu1 %v3129_v52 }
 0x17b   : > { %2904 = vmatmul.mubr.bf16.gmra.mxu1 %v4218_v3  ;;  %2958 = vmatpush3.bf16.msra.mxu0 %v3136_v43 }
 0x17c   : > { %2936 = vmatpush3.bf16.msra.mxu1 %v3129_v52  ;;  %2947 = vmatprep.mubr.bf16.mxu1 %v4219_v33 }
 0x17d   : > { %2937 = vmatprep.subr.bf16.mxu1 %v3130_v26  ;;  %2959 = vmatprep.subr.bf16.mxu0 %v3137_v1 }
 0x17e   : > { %2928 = vmatmul.mubr.bf16.gmra.mxu0 %v4220_v38 }
 0x17f   : > { %2960 = vmatpush3.bf16.msra.mxu0 %v3137_v1 }
 0x180   : > { %2938 = vmatpush3.bf16.msra.mxu1 %v3130_v26  ;;  %2961 = vmatprep.subr.bf16.mxu0 %v3138_v62 }
 0x181   : > { %2939 = vmatprep.subr.bf16.mxu1 %v3131_v28 }
 0x183   : > { %2962 = vmatpush3.bf16.msra.mxu0 %v3138_v62 }
 0x184   : > { %2940 = vmatpush3.bf16.msra.mxu1 %v3131_v28  ;;  %2963 = vmatprep.subr.bf16.mxu0 %v3139_v22 }
 0x185   : > { %2941 = vmatprep.subr.bf16.mxu1 %v3132_v63 }
 0x187   : > { %2964 = vmatpush3.bf16.msra.mxu0 %v3139_v22 }
 0x188   : > { %2942 = vmatpush3.bf16.msra.mxu1 %v3132_v63  ;;  %2965 = vmatprep.subr.bf16.mxu0 %v3140_v12 }
 0x189   : > { %2943 = vmatprep.subr.bf16.mxu1 %v3133_v50 }
 0x18b   : > { %2966 = vmatpush3.bf16.msra.mxu0 %v3140_v12 }
 0x18c   : > { %2944 = vmatpush3.bf16.msra.mxu1 %v3133_v50  ;;  %2967 = vmatprep.subr.bf16.mxu0 %v3141_v13 }
 0x18d   : > { %2945 = vmatprep.subr.bf16.mxu1 %v3134_v5 }
 0x18f   : > { %2968 = vmatpush3.bf16.msra.mxu0 %v3141_v13 }
 0x190   : > { %2946 = vmatpush3.bf16.msra.mxu1 %v3134_v5  ;;  %2969 = vmatprep.subr.bf16.mxu0 %v3142_v10 }
 0x191   : > { %2979 = vmatprep.subr.bf16.mxu1 %v3135_v51 }
 0x193   : > { %2948 = vmatmul.mubr.bf16.vlgmr.msra.gmra.mxu1 %v4221_v34  ;;  %2970 = vmatpush3.bf16.msra.mxu0 %v3142_v10 }
 0x194   : > { %2951 = vmatprep.mubr.bf16.mxu1 %v4222_v55  ;;  %2987 = vmatpush3.bf16.msra.mxu1 %v3135_v51 }
 0x195   : > { %2980 = vmatprep.subr.bf16.mxu1 %v3136_v43 }
 0x198   : > { %2988 = vmatpush3.bf16.msra.mxu1 %v3136_v43 }
 0x199   : > { %2981 = vmatprep.subr.bf16.mxu1 %v3137_v1 }
 0x19b   : > { %2952 = vmatmul.mubr.bf16.gmra.mxu1 %v4223_v44 }
 0x19c   : > { %2989 = vmatpush3.bf16.msra.mxu1 %v3137_v1 }
 0x19d   : > { %2982 = vmatprep.subr.bf16.mxu1 %v3138_v62 }
 0x1a0   : > { %2990 = vmatpush3.bf16.msra.mxu1 %v3138_v62 }
 0x1a1   : > { %2983 = vmatprep.subr.bf16.mxu1 %v3139_v22 }
 0x1a4   : > { %2991 = vmatpush3.bf16.msra.mxu1 %v3139_v22 }
 0x1a5   : > { %2984 = vmatprep.subr.bf16.mxu1 %v3140_v12 }
 0x1a8   : > { %2992 = vmatpush3.bf16.msra.mxu1 %v3140_v12 }
 0x1a9   : > { %2985 = vmatprep.subr.bf16.mxu1 %v3141_v13 }
 0x1ac   : > { %2993 = vmatpush3.bf16.msra.mxu1 %v3141_v13 }
 0x1ad   : > { %2986 = vmatprep.subr.bf16.mxu1 %v3142_v10 }
 0x1b0   : > { %2994 = vmatpush3.bf16.msra.mxu1 %v3142_v10 }
 0x1d3   : > { %v4093_v60 = vpop.f32.mrf.mxu1 }
 0x1d5   : > { %v4098_v20 = vpop.f32.mrf.mxu1 }
 0x1d6   : > { %v2781_v48 = vpop.f32.mrf.mxu0 }
 0x1d7   : > { %v2758_v14 = vpop.f32.mrf.mxu1  ;;  %v912_v44 = vadd.f32 %v2781_v48, %v4093_v60 }
 0x1d8   : > { %v903_v41 = vpop.f32.mrf.mxu0 }
 0x1d9   : > { %v793_v59 = vpop.f32.mrf.mxu1  ;;  %v904_v55 = vadd.f32 %v903_v41, %v4098_v20 }
 0x1da   : > { %v2782_v53 = vpop.f32.mrf.mxu0 }
 0x1db   : > { %v4108_v40 = vpop.f32.mrf.mxu1  ;;  %v915_v51 = vadd.f32 %v2782_v53, %v2758_v14 }
 0x1dc   : > { %4225 = vst [vmem:[#allocation6_spill] sm:$0xff] %v4108_v40  ;;  %v906_v37 = vpop.f32.mrf.mxu0 }
 0x1dd   : > { %v806_v25 = vpop.f32.mrf.mxu1  ;;  %v907_v12 = vadd.f32 %v906_v37, %v793_v59 }
 0x1de   : > { %v2785_v39 = vpop.f32.mrf.mxu0 }
 0x1df   : > { %v2762_v7 = vpop.f32.mrf.mxu1 }
 0x1e0   : > { %v919_v21 = vpop.f32.mrf.mxu0 }
 0x1e1   : > { %v4110_v2 = vpop.f32.mrf.mxu1  ;;  %v920_v40 = vadd.f32 %v919_v21, %v806_v25 }
 0x1e2   : > { %4226 = vst [vmem:[#allocation7_spill] sm:$0xff] %v4110_v2  ;;  %v2786_v4 = vpop.f32.mrf.mxu0 }
 0x1e3   : > { %v4230_v41 = vld [vmem:[#allocation6_spill] sm:$0xff]  ;;  %v931_v14 = vadd.f32 %v2786_v4, %v2762_v7 }
 0x1e4   : > { %v922_v16 = vpop.f32.mrf.mxu0  ;;  %v928_v48 = vadd.f32 %v2785_v39, %v4230_v41 }
 0x1f3   : > { %v2805_v57 = vpop.f32.mrf.mxu1 }
 0x1f4   : > { %v1126_v1 = vadd.f32 %v2805_v57, %v912_v44  ;;  %v4231_v57 = vld [vmem:[#allocation7_spill] sm:$0xff] }
 0x1f5   : > { %v1093_v36 = vpop.f32.mrf.mxu1  ;;  %v923_v44 = vadd.f32 %v922_v16, %v4231_v57 }
 0x1f6   : > { %v2829_v46 = vpop.f32.mrf.mxu0  ;;  %v1124_v43 = vadd.f32 %v1093_v36, %v904_v55 }
 0x1f7   : > { %v2806_v18 = vpop.f32.mrf.mxu1 }
 0x1f8   : > { %v1274_v42 = vpop.f32.mrf.mxu0  ;;  %v1127_v13 = vadd.f32 %v2806_v18, %v915_v51 }
 0x1f9   : > { %v1096_v32 = vpop.f32.mrf.mxu1  ;;  %v1305_v10 = vadd.f32 %v1274_v42, %v1124_v43 }
 0x1fa   : > { %v2830_v45 = vpop.f32.mrf.mxu0  ;;  %v1125_v56 = vadd.f32 %v1096_v32, %v907_v12 }
 0x1fb   : > { %v2809_v29 = vpop.f32.mrf.mxu1 }
 0x1fc   : > { %v1277_v47 = vpop.f32.mrf.mxu0  ;;  %v1130_v37 = vadd.f32 %v2809_v29, %v928_v48 }
 0x1fd   : > { %v1109_v11 = vpop.f32.mrf.mxu1  ;;  %v1306_v53 = vadd.f32 %v1277_v47, %v1125_v56 }
 0x1fe   : > { %v2833_v61 = vpop.f32.mrf.mxu0  ;;  %v1128_v36 = vadd.f32 %v1109_v11, %v920_v40 }
 0x1ff   : > { %v2810_v9 = vpop.f32.mrf.mxu1 }
 0x200   : > { %v1290_v49 = vpop.f32.mrf.mxu0  ;;  %v1131_v42 = vadd.f32 %v2810_v9, %v931_v14 }
 0x201   : > { %v1112_v23 = vpop.f32.mrf.mxu1  ;;  %v1309_v25 = vadd.f32 %v1290_v49, %v1128_v36 }
 0x202   : > { %v2834_v54 = vpop.f32.mrf.mxu0  ;;  %v1129_v51 = vadd.f32 %v1112_v23, %v923_v44 }
 0x203   : > { %v1312_v56 = vadd.f32 %v2834_v54, %v1131_v42 }
 0x204   : > { %v1293_v27 = vpop.f32.mrf.mxu0 }
 0x205   : > { %v1310_v16 = vadd.f32 %v1293_v27, %v1129_v51 }
 0x213   : > { %v2853_v8 = vpop.f32.mrf.mxu1 }
 0x215   : > { %v1415_v17 = vpop.f32.mrf.mxu1 }
 0x216   : > { %v2877_v15 = vpop.f32.mrf.mxu0  ;;  %v1446_v20 = vadd.f32 %v1415_v17, %v1305_v10  ;;  %v1311_v17 = vadd.f32 %v2833_v61, %v1130_v37 }
 0x217   : > { %v2854_v6 = vpop.f32.mrf.mxu1 }
 0x218   : > { %v1596_v31 = vpop.f32.mrf.mxu0 }
 0x219   : > { %v1418_v24 = vpop.f32.mrf.mxu1  ;;  %v1627_v32 = vadd.f32 %v1596_v31, %v1446_v20 }
 0x21a   : > { %v2878_v19 = vpop.f32.mrf.mxu0 }
 0x21b   : > { %v2857_v58 = vpop.f32.mrf.mxu1 }
 0x21c   : > { %v1599_v35 = vpop.f32.mrf.mxu0  ;;  %v1452_v29 = vadd.f32 %v2857_v58, %v1311_v17  ;;  %v2568_v58 = vld [vmem:[%s4154_s6] ss:$0 sm:$0xff] }
 0x21d   : > { %v1431_v0 = vpop.f32.mrf.mxu1 }
 0x21e   : > { %v4112_v30 = vpop.f32.mrf.mxu0  ;;  %v1450_v4 = vadd.f32 %v1431_v0, %v1309_v25 }
 0x21f   : > { %v2858_v52 = vpop.f32.mrf.mxu1  ;;  %4227 = vst [vmem:[#allocation8_spill] sm:$0xff] %v4112_v30  ;;  %v1307_v30 = vadd.f32 %v2829_v46, %v1126_v1  ;;  %v1447_v46 = vadd.f32 %v1418_v24, %v1306_v53 }
 0x220   : > { %v1612_v33 = vpop.f32.mrf.mxu0 }
 0x221   : > { %v1434_v26 = vpop.f32.mrf.mxu1  ;;  %v1448_v60 = vadd.f32 %v2853_v8, %v1307_v30  ;;  %v1628_v40 = vadd.f32 %v1599_v35, %v1447_v46 }
 0x222   : > { %v4114_v38 = vpop.f32.mrf.mxu0  ;;  %v1451_v24 = vadd.f32 %v1434_v26, %v1310_v16  ;;  %v2569_v16 = vld [vmem:[%s4155_s7] ss:$0 sm:$0xff] }
 0x223   : > { %4228 = vst [vmem:[#allocation5_spill] sm:$0xff] %v4114_v38  ;;  %v1629_v43 = vadd.f32 %v2877_v15, %v1448_v60 }
 0x224   : > { %v4116_v50 = vpop.f32.mrf.mxu0 }
 0x225   : > { %4229 = vst [vmem:[#allocation4_spill] sm:$0xff] %v4116_v50  ;;  %v1308_v50 = vadd.f32 %v2830_v45, %v1127_v13 }
 0x227   : > { %v1449_v55 = vadd.f32 %v2854_v6, %v1308_v50  ;;  %v1453_v6 = vadd.f32 %v2858_v52, %v1312_v56 }
 0x229   : > { %v1630_v21 = vadd.f32 %v2878_v19, %v1449_v55  ;;  %v1631_v19 = vadd.f32 %v1612_v33, %v1450_v4 }
 0x22a   : > { %v4233_v35 = vld [vmem:[#allocation5_spill] sm:$0xff] }
 0x22b   : > { %v1634_v0 = vadd.f32 %v4233_v35, %v1453_v6 }
 0x22c   : > { %v4234_v26 = vld [vmem:[#allocation4_spill] sm:$0xff] }
 0x233   : > { %v2901_v3 = vpop.f32.mrf.mxu1 }
 0x234   : > { %v1810_v39 = vadd.f32 %v2901_v3, %v1629_v43  ;;  %v4232_v3 = vld [vmem:[#allocation8_spill] sm:$0xff] }
 0x235   : > { %v1777_v28 = vpop.f32.mrf.mxu1 }
 0x236   : > { %v2925_v5 = vpop.f32.mrf.mxu0  ;;  %v1808_v45 = vadd.f32 %v1777_v28, %v1627_v32  ;;  %v1633_v28 = vadd.f32 %v4232_v3, %v1452_v29 }
 0x237   : > { %v2902_v63 = vpop.f32.mrf.mxu1  ;;  %v1991_v23 = vadd.f32 %v2925_v5, %v1810_v39  ;;  %v1632_v5 = vadd.f32 %v4234_v26, %v1451_v24  ;;  %v4235_v24 = vld [vmem:[#allocation20_spill] sm:$0xff] }
 0x238   : > { %v1958_v62 = vpop.f32.mrf.mxu0  ;;  %v1811_v11 = vadd.f32 %v2902_v63, %v1630_v21 }
 0x239   : > { %v1780_v34 = vpop.f32.mrf.mxu1  ;;  %v1989_v9 = vadd.f32 %v1958_v62, %v1808_v45 }
 0x23a   : > { %v2926_v38 = vpop.f32.mrf.mxu0  ;;  %v1809_v31 = vadd.f32 %v1780_v34, %v1628_v40 }
 0x23b   : > { %v2905_v22 = vpop.f32.mrf.mxu1  ;;  %v1992_v30 = vadd.f32 %v2926_v38, %v1811_v11 }
 0x23c   : > { %v1961_v59 = vpop.f32.mrf.mxu0  ;;  %v1814_v34 = vadd.f32 %v2905_v22, %v1633_v28 }
 0x23d   : > { %v1793_v2 = vpop.f32.mrf.mxu1  ;;  %v1990_v63 = vadd.f32 %v1961_v59, %v1809_v31 }
 0x23e   : > { %v2929_v8 = vpop.f32.mrf.mxu0  ;;  %v1812_v27 = vadd.f32 %v1793_v2, %v1631_v19  ;;  %v4236_v19 = vld [vmem:[#allocation16_spill] sm:$0xff] }
 0x23f   : > { %v2906_v18 = vpop.f32.mrf.mxu1  ;;  %v1995_v2 = vadd.f32 %v2929_v8, %v1814_v34 }
 0x240   : > { %v1974_v15 = vpop.f32.mrf.mxu0  ;;  %v1815_v38 = vadd.f32 %v2906_v18, %v1634_v0  ;;  %v4238_v0 = vld [vmem:[#allocation18_spill] sm:$0xff] }
 0x241   : > { %v1796_v7 = vpop.f32.mrf.mxu1  ;;  %v1993_v41 = vadd.f32 %v1974_v15, %v1812_v27 }
 0x242   : > { %v2930_v1 = vpop.f32.mrf.mxu0  ;;  %v1813_v48 = vadd.f32 %v1796_v7, %v1632_v5 }
 0x243   : > { %v1996_v55 = vadd.f32 %v2930_v1, %v1815_v38  ;;  %v4240_v38 = vld [vmem:[#allocation3_spill] sm:$0xff] }
 0x244   : > { %v1977_v14 = vpop.f32.mrf.mxu0 }
 0x245   : > { %v1994_v18 = vadd.f32 %v1977_v14, %v1813_v48  ;;  %v4242_v48 = vld [vmem:[#allocation25_spill] sm:$0xff] }
 0x253   : > { %v2949_v47 = vpop.f32.mrf.mxu1 }
 0x254   : > { %v2172_v50 = vadd.f32 %v2949_v47, %v1991_v23 }
 0x255   : > { %v2139_v49 = vpop.f32.mrf.mxu1 }
 0x256   : > { %v2170_v61 = vadd.f32 %v2139_v49, %v1989_v9  ;;  %v2187_v10 = vadd.f32 %v2568_v58, %v2172_v50 }
 0x257   : > { %v2950_v54 = vpop.f32.mrf.mxu1 }
 0x258   : > { %v2173_v52 = vadd.f32 %v2950_v54, %v1992_v30  ;;  %v2185_v62 = vadd.f32 %v2568_v58, %v2170_v61  ;;  %v2195_v22 = vmax.f32 %v2187_v10, 0.0  ;;  %v4237_v61 = vld [vmem:[#allocation23_spill] sm:$0xff] }
 0x259   : > { %v2142_v33 = vpop.f32.mrf.mxu1 }
 0x25a   : > { %v2188_v12 = vadd.f32 %v2568_v58, %v2173_v52  ;;  %v2171_v13 = vadd.f32 %v2142_v33, %v1990_v63  ;;  %v2193_v57 = vmax.f32 %v2185_v62, 0.0  ;;  %v4239_v33 = vld [vmem:[#allocation2_spill] sm:$0xff] }
 0x25b   : > { %v2953_v20 = vpop.f32.mrf.mxu1  ;;  %v551_v62 = vadd.f32 %v4240_v38, %v4239_v33 }
 0x25c   : > { %v2186_v60 = vadd.f32 %v2568_v58, %v2171_v13  ;;  %v2196_v53 = vmax.f32 %v2188_v12, 0.0  ;;  %v2176_v59 = vadd.f32 %v2953_v20, %v1995_v2  ;;  %v4241_v13 = vld [vmem:[#allocation28_spill] sm:$0xff] }
 0x25d   : > { %v2155_v36 = vpop.f32.mrf.mxu1 }
 0x25e   : > { %v2194_v44 = vmax.f32 %v2186_v60, 0.0  ;;  %v2174_v37 = vadd.f32 %v2155_v36, %v1993_v41  ;;  %v2202_v51 = vpack.c.bf16 %v2196_v53, %v2195_v22  ;;  %v2191_v17 = vadd.f32 %v2568_v58, %v2176_v59 }
 0x25f   : > { %v2954_v42 = vpop.f32.mrf.mxu1 }
 0x260   : > { %v2177_v32 = vadd.f32 %v2954_v42, %v1996_v55  ;;  %v2201_v46 = vpack.c.bf16 %v2194_v44, %v2193_v57  ;;  %v2189_v25 = vadd.f32 %v2568_v58, %v2174_v37  ;;  %v2199_v40 = vmax.f32 %v2191_v17, 0.0  ;;  %v4243_v55 = vld [vmem:[#allocation26_spill] sm:$0xff] }
 0x261   : > { %v2158_v43 = vpop.f32.mrf.mxu1 }
 0x262   : > { %v2192_v21 = vadd.f32 %v2568_v58, %v2177_v32  ;;  %v2175_v45 = vadd.f32 %v2158_v43, %v1994_v18  ;;  %2971 = vmatprep.mubr.bf16.mxu0 %v2201_v46  ;;  %v2197_v7 = vmax.f32 %v2189_v25, 0.0 }
 0x263   : > { %2972 = vmatmul.mubr.bf16.vlgmr.msra.gmra.mxu0 %v2202_v51 }
 0x264   : > { %v2190_v39 = vadd.f32 %v2568_v58, %v2175_v45  ;;  %v2200_v8 = vmax.f32 %v2192_v21, 0.0 }
 0x266   : > { %v2198_v56 = vmax.f32 %v2190_v39, 0.0  ;;  %v2204_v11 = vpack.c.bf16 %v2200_v8, %v2199_v40 }
 0x268   : > { %v2203_v4 = vpack.c.bf16 %v2198_v56, %v2197_v7 }
 0x26a   : > { %2975 = vmatprep.mubr.bf16.mxu1 %v2203_v4 }
 0x26b   : > { %2976 = vmatmul.mubr.bf16.vlgmr.msra.gmra.mxu1 %v2204_v11 }
 0x323   : > { %v2973_v29 = vpop.f32.mrf.mxu0 }
 0x324   : > { %v2319_v47 = vadd.f32 %v2973_v29, %v2569_v16 }
 0x325   : > { %v2310_v6 = vpop.f32.mrf.mxu0 }
 0x326   : > { %v2311_v9 = vadd.f32 %v2569_v16, %v2310_v6  ;;  %v2343_v23 = vadd.f32 %v2319_v47, %v4235_v24 }
 0x327   : > { %v2974_v31 = vpop.f32.mrf.mxu0 }
 0x328   : > { %v2322_v15 = vadd.f32 %v2974_v31, %v2569_v16  ;;  %v2341_v30 = vadd.f32 %v2311_v9, %v4236_v19  ;;  %v2351_v54 = vmax.f32 %v2343_v23, 0.0 }
 0x329   : > { %v2313_v49 = vpop.f32.mrf.mxu0 }
 0x32a   : > { %v2344_v3 = vadd.f32 %v2322_v15, %v4237_v61  ;;  %v2314_v28 = vadd.f32 %v2569_v16, %v2313_v49  ;;  %v2349_v52 = vmax.f32 %v2341_v30, 0.0 }
 0x32b   : > { %v2977_v50 = vpop.f32.mrf.mxu1 }
 0x32c   : > { %v2352_v35 = vmax.f32 %v2344_v3, 0.0  ;;  %v2342_v63 = vadd.f32 %v2314_v28, %v4238_v0  ;;  %v2335_v27 = vadd.f32 %v2977_v50, %v2569_v16 }
 0x32d   : > { %v2326_v58 = vpop.f32.mrf.mxu1 }
 0x32e   : > { %v2604_v26 = vpack.c.bf16 %v2352_v35, %v2351_v54  ;;  %v2350_v5 = vmax.f32 %v2342_v63, 0.0  ;;  %v2327_v34 = vadd.f32 %v2569_v16, %v2326_v58  ;;  %v2347_v10 = vadd.f32 %v2335_v27, %v4241_v13 }
 0x32f   : > { %v2978_v1 = vpop.f32.mrf.mxu1 }
 0x330   : > { %2616 = vst [vmem:[%s329_s25 + $0x8] sm:$0xff] %v2604_v26   ;;  %v2599_v12 = vpack.c.bf16 %v2350_v5, %v2349_v52  ;;  %v2338_v20 = vadd.f32 %v2978_v1, %v2569_v16  ;;  %v2345_v60 = vadd.f32 %v2327_v34, %v4242_v48  ;;  %v2355_v53 = vmax.f32 %v2347_v10, 0.0 }
 0x331   : > { %v2329_v41 = vpop.f32.mrf.mxu1 }
 0x332   : > { %2600 = vst [vmem:[%s329_s25] sm:$0xff] %v2599_v12   ;;  %v2348_v2 = vadd.f32 %v2338_v20, %v551_v62  ;;  %v2330_v14 = vadd.f32 %v2569_v16, %v2329_v41  ;;  %v2353_v44 = vmax.f32 %v2345_v60, 0.0 }
 0x334   : > { %v2356_v36 = vmax.f32 %v2348_v2, 0.0  ;;  %v2346_v57 = vadd.f32 %v2330_v14, %v4243_v55 }
 0x336   : > { %v2614_v37 = vpack.c.bf16 %v2356_v36, %v2355_v53  ;;  %v2354_v22 = vmax.f32 %v2346_v57, 0.0 }
 0x338   : > { %2618 = vst [vmem:[%s329_s25 + $0x18] sm:$0xff] %v2614_v37   ;;  %v2609_v59 = vpack.c.bf16 %v2354_v22, %v2353_v44 }
 0x33a   : > { %2617 = vst [vmem:[%s329_s25 + $0x10] sm:$0xff] %v2609_v59  }
 0x33b PF: > { %s18_s27 = sadd.s32 1, %s3149_s27  }
 0x33c   : > { %p15_p4 = scmp.ge.s32.totalorder %s18_s27, 4  }
 0x33e   :  { %17 = sbr.rel (!%p15_p4) target bundleno = 1 (0x1), region = 85 }

</bundles_post_ra>
